<compile_context>
chip_gen: v7x
topology: tpu7x:2x2x1
jax: 0.10.0
libtpu: 0.0.40
codegen_flags: <defaults>
</compile_context>

<pallas_src>
import jax
import jax.numpy as jnp
from jax import lax
from jax.experimental import pallas as pl
from jax.experimental.pallas import tpu as pltpu

# ---- static configuration (stands in for `args`) ----
N = 8                         # batch size (args.batch_size)
C, H, W = 4, 16, 16           # small NCHW images
FEAT_IN = C * H * W           # flattened image -> stand-in backbone input
OUT = 128                     # backbone.fc.in_features (self.out), lane-dense
PROJ = (128, 128, 128)        # args.projector = "128-128-128", lane-dense
LAMBD = 0.0051                # args.lambd
EPS = 1e-5                    # nn.BatchNorm1d default eps
TWO_N = 2 * N


def _bn_stats3(h3):
    """Per-branch BatchNorm1d stats (training mode, biased variance).

    h3: [2, N, F] f32 -> (mean [2,1,F], inv_std [2,1,F]).
    One pass (sum, sum-of-squares) so the two sublane reductions are
    independent; variance clamped at 0 to guard E[x^2]-mean^2 cancellation.
    """
    s = jnp.sum(h3, axis=1, keepdims=True)
    sq = jnp.sum(h3 * h3, axis=1, keepdims=True)
    mean = s * jnp.float32(1.0 / N)
    var = jnp.maximum(sq * jnp.float32(1.0 / N) - mean * mean, 0.0)
    inv = lax.rsqrt(var + jnp.float32(EPS))
    return mean, inv


def _bn_relu(h, gamma, beta):
    """BatchNorm1d(affine) + ReLU with per-branch stats; in/out shape [2N, F].

    Affine folded into the tiny [2,1,F] stats (a = inv*gamma, b = beta-mean*a)
    so per-element work on the [2N,F] activation is one fma + one max.
    The [2N,F] <-> [2,N,F] reshapes are tile-aligned (N == 8 sublanes, F a
    multiple of 128 lanes) and fold away without a relayout.
    """
    fdim = h.shape[-1]
    h3 = h.reshape(2, N, fdim)
    mean, inv = _bn_stats3(h3)
    a = inv * gamma                       # [2,1,F]
    b = beta - mean * a                   # [2,1,F]
    return jnp.maximum(h3 * a + b, 0.0).reshape(TWO_N, fdim)


def barlow_twins_kernel(y1_ref, y2_ref, w_stem_ref, w1_ref, g1_ref, b1_ref,
                        w2_ref, g2_ref, b2_ref, w3_ref, loss_ref):
    # In-kernel bf16 cast of the two views (no wrapper-side concat/cast).
    y1 = y1_ref[...].astype(jnp.bfloat16)          # [N, FEAT_IN]
    y2 = y2_ref[...].astype(jnp.bfloat16)
    w_stem = w_stem_ref[...]                       # [OUT, FEAT_IN] bf16, lane-dense
    w1, w2, w3 = w1_ref[...], w2_ref[...], w3_ref[...]   # bf16
    g1, b1 = g1_ref[...], b1_ref[...]              # f32 [1, P]
    g2, b2 = g2_ref[...], b2_ref[...]

    # TODO(synk): the real ResNet backbone (args.arch, normalize=True) is an
    # external dependency; stand-in = single linear stem on the flat image.
    # Contract over the lane axis of the transposed weight (trans_b form) so
    # the largest operand stays lane-dense (MXU transposed-operand load).
    dn_t = (((1,), (1,)), ((), ()))
    f1 = lax.dot_general(y1, w_stem, dn_t, preferred_element_type=jnp.float32)
    f2 = lax.dot_general(y2, w_stem, dn_t, preferred_element_type=jnp.float32)
    f = jnp.concatenate([f1, f2], axis=0)          # [2N, OUT] f32 (small stack)

    # projector: Linear(no bias) -> BN -> ReLU -> Linear -> BN -> ReLU -> Linear
    # Both branches share one MXU pass (M = 2N) through the shared weights.
    h = jnp.dot(f.astype(jnp.bfloat16), w1, preferred_element_type=jnp.float32)
    h = _bn_relu(h, g1, b1)
    h = jnp.dot(h.astype(jnp.bfloat16), w2, preferred_element_type=jnp.float32)
    h = _bn_relu(h, g2, b2)
    z = jnp.dot(h.astype(jnp.bfloat16), w3, preferred_element_type=jnp.float32)

    # self.bn = nn.BatchNorm1d(sizes[-1], affine=False) -- per-branch stats;
    # c.div_(batch_size) folded into branch-0's inv_std (no [N,P] pre-scale).
    p = PROJ[2]
    z3 = z.reshape(2, N, p)
    mean, inv = _bn_stats3(z3)
    z1n = (z3[0] - mean[0]) * (inv[0] * jnp.float32(1.0 / N))   # [N, P]
    z2n = (z3[1] - mean[1]) * inv[1]                            # [N, P]

    # c = bn(z1).T @ bn(z2) / N : contract the batch axis directly (no explicit
    # transpose).  f32 operands, f32 accumulation (see review note on precision;
    # parity is asserted against a HIGHEST-precision reference in __main__).
    c = lax.dot_general(z1n, z2n, (((0,), (0,)), ((), ())),
                        preferred_element_type=jnp.float32)     # [P, P]

    # loss = on_diag + lambd * off_diag, fused into one select + one reduction.
    row = lax.broadcasted_iota(jnp.int32, (p, p), 0)
    col = lax.broadcasted_iota(jnp.int32, (p, p), 1)
    loss_ref[0, 0] = jnp.sum(jnp.where(row == col,
                                       (c - 1.0) ** 2,
                                       jnp.float32(LAMBD) * (c * c)))


def barlow_twins_loss(y1, y2, params, step=0):
    del step  # unused by the original forward as well
    # Free metadata reshape only; no concat / dtype-convert fusion in the
    # wrapper.  Weights are already bf16 (cast once at init).
    y1f = y1.reshape(N, FEAT_IN)
    y2f = y2.reshape(N, FEAT_IN)
    args = (y1f, y2f,
            params['w_stem_t'],
            params['w1'], params['g1'], params['b1'],
            params['w2'], params['g2'], params['b2'],
            params['w3'])

    flops = (2 * TWO_N * (FEAT_IN * OUT + OUT * PROJ[0]
                          + PROJ[0] * PROJ[1] + PROJ[1] * PROJ[2])
             + 2 * N * PROJ[2] * PROJ[2])
    bytes_accessed = sum(int(a.size) * a.dtype.itemsize for a in args) + 4
    transcendentals = 2 * (PROJ[0] + PROJ[1] + PROJ[2])         # rsqrt per BN

    vmem = pl.BlockSpec(memory_space=pltpu.MemorySpace.VMEM)
    loss = pl.pallas_call(
        barlow_twins_kernel,
        out_shape=jax.ShapeDtypeStruct((1, 1), jnp.float32),
        in_specs=[vmem] * len(args),
        out_specs=pl.BlockSpec(memory_space=pltpu.MemorySpace.SMEM),
        cost_estimate=pl.CostEstimate(flops=flops,
                                      transcendentals=transcendentals,
                                      bytes_accessed=bytes_accessed),
    )(*args)
    return loss[0, 0]


def init_params(key):
    ks = jax.random.split(key, 4)

    def lin(k, fan_in, shape):
        # stored bf16 ONCE here so no per-step convert fusions are needed.
        return (jax.random.normal(k, shape, jnp.float32)
                * (1.0 / jnp.sqrt(fan_in))).astype(jnp.bfloat16)

    return {
        # stem weight in PyTorch nn.Linear layout [out, in] -> lane-dense.
        'w_stem_t': lin(ks[0], FEAT_IN, (OUT, FEAT_IN)),
        'w1': lin(ks[1], OUT, (OUT, PROJ[0])),
        'g1': jnp.ones((1, PROJ[0]), jnp.float32),
        'b1': jnp.zeros((1, PROJ[0]), jnp.float32),
        'w2': lin(ks[2], PROJ[0], (PROJ[0], PROJ[1])),
        'g2': jnp.ones((1, PROJ[1]), jnp.float32),
        'b2': jnp.zeros((1, PROJ[1]), jnp.float32),
        'w3': lin(ks[3], PROJ[1], (PROJ[1], PROJ[2])),
    }


# ---------------- pure-f32 reference (for tolerance validation) --------------
def _bn_ref(h, gamma=None, beta=None):
    mean = jnp.mean(h, axis=0, keepdims=True)
    var = jnp.mean((h - mean) ** 2, axis=0, keepdims=True)      # biased
    hn = (h - mean) / jnp.sqrt(var + EPS)
    if gamma is not None:
        hn = hn * gamma + beta
    return hn


def barlow_twins_ref(y1, y2, params):
    """Pure-f32 JAX reference of the PyTorch forward (HIGHEST matmul precision)."""
    hp = lax.Precision.HIGHEST
    w_stem = params['w_stem_t'].astype(jnp.float32)
    w1 = params['w1'].astype(jnp.float32)
    w2 = params['w2'].astype(jnp.float32)
    w3 = params['w3'].astype(jnp.float32)

    def branch(y):
        x = y.reshape(N, FEAT_IN).astype(jnp.float32)
        f = jnp.dot(x, w_stem.T, precision=hp)
        h = jnp.maximum(_bn_ref(jnp.dot(f, w1, precision=hp),
                                params['g1'], params['b1']), 0.0)
        h = jnp.maximum(_bn_ref(jnp.dot(h, w2, precision=hp),
                                params['g2'], params['b2']), 0.0)
        return _bn_ref(jnp.dot(h, w3, precision=hp))

    z1, z2 = branch(y1), branch(y2)
    c = jnp.dot(z1.T, z2, precision=hp) / N
    d = jnp.diagonal(c)
    on_diag = jnp.sum((d - 1.0) ** 2)
    off_diag = jnp.sum(c * c) - jnp.sum(d * d)
    return on_diag + LAMBD * off_diag


if __name__ == "__main__":
    key = jax.random.PRNGKey(0)
    k_y1, k_y2, k_p = jax.random.split(key, 3)
    y1 = jax.random.normal(k_y1, (N, C, H, W), jnp.float32)
    y2 = jax.random.normal(k_y2, (N, C, H, W), jnp.float32)
    params = init_params(k_p)

    loss_fn = jax.jit(barlow_twins_loss)
    loss = jax.block_until_ready(loss_fn(y1, y2, params, 0))
    assert loss.shape == () and bool(jnp.isfinite(loss))

    # Tolerance-validated against the pure-f32 reference (bf16 operands in the
    # kernel are the only approximation; weights are identical in both paths).
    ref = float(barlow_twins_ref(y1, y2, params))
    got = float(loss)
    assert abs(got - ref) <= 0.05 * abs(ref) + 0.1, (got, ref)

    print("KERNEL_OK")
</pallas_src>

<mosaic_0001>
module attributes {stable_mosaic.version = 11 : i64} {
  func.func @barlow_twins_kernel(%arg0: memref<8x1024xf32, #tpu.memory_space<vmem>>, %arg1: memref<8x1024xf32, #tpu.memory_space<vmem>>, %arg2: memref<128x1024xbf16, #tpu.memory_space<vmem>>, %arg3: memref<128x128xbf16, #tpu.memory_space<vmem>>, %arg4: memref<1x128xf32, #tpu.memory_space<vmem>>, %arg5: memref<1x128xf32, #tpu.memory_space<vmem>>, %arg6: memref<128x128xbf16, #tpu.memory_space<vmem>>, %arg7: memref<1x128xf32, #tpu.memory_space<vmem>>, %arg8: memref<1x128xf32, #tpu.memory_space<vmem>>, %arg9: memref<128x128xbf16, #tpu.memory_space<vmem>>, %arg10: memref<1x1xf32, #tpu.memory_space<smem>>) attributes {dimension_semantics = [], scalar_prefetch = 0 : i64, scratch_operands = 0 : i64, tpu.core_type = #tpu.core_type<tc>} {
    %c0 = arith.constant 0 : index
    %c0_0 = arith.constant 0 : index
    %0 = vector.load %arg0[%c0, %c0_0] : memref<8x1024xf32, #tpu.memory_space<vmem>>, vector<8x1024xf32>
    %1 = arith.truncf %0 : vector<8x1024xf32> to vector<8x1024xbf16>
    %c0_1 = arith.constant 0 : index
    %c0_2 = arith.constant 0 : index
    %2 = vector.load %arg1[%c0_1, %c0_2] : memref<8x1024xf32, #tpu.memory_space<vmem>>, vector<8x1024xf32>
    %3 = arith.truncf %2 : vector<8x1024xf32> to vector<8x1024xbf16>
    %c0_3 = arith.constant 0 : index
    %c0_4 = arith.constant 0 : index
    %4 = vector.load %arg2[%c0_3, %c0_4] : memref<128x1024xbf16, #tpu.memory_space<vmem>>, vector<128x1024xbf16>
    %c0_5 = arith.constant 0 : index
    %c0_6 = arith.constant 0 : index
    %5 = vector.load %arg3[%c0_5, %c0_6] : memref<128x128xbf16, #tpu.memory_space<vmem>>, vector<128x128xbf16>
    %c0_7 = arith.constant 0 : index
    %c0_8 = arith.constant 0 : index
    %6 = vector.load %arg6[%c0_7, %c0_8] : memref<128x128xbf16, #tpu.memory_space<vmem>>, vector<128x128xbf16>
    %c0_9 = arith.constant 0 : index
    %c0_10 = arith.constant 0 : index
    %7 = vector.load %arg9[%c0_9, %c0_10] : memref<128x128xbf16, #tpu.memory_space<vmem>>, vector<128x128xbf16>
    %c0_11 = arith.constant 0 : index
    %c0_12 = arith.constant 0 : index
    %8 = vector.load %arg4[%c0_11, %c0_12] : memref<1x128xf32, #tpu.memory_space<vmem>>, vector<1x128xf32>
    %c0_13 = arith.constant 0 : index
    %c0_14 = arith.constant 0 : index
    %9 = vector.load %arg5[%c0_13, %c0_14] : memref<1x128xf32, #tpu.memory_space<vmem>>, vector<1x128xf32>
    %c0_15 = arith.constant 0 : index
    %c0_16 = arith.constant 0 : index
    %10 = vector.load %arg7[%c0_15, %c0_16] : memref<1x128xf32, #tpu.memory_space<vmem>>, vector<1x128xf32>
    %c0_17 = arith.constant 0 : index
    %c0_18 = arith.constant 0 : index
    %11 = vector.load %arg8[%c0_17, %c0_18] : memref<1x128xf32, #tpu.memory_space<vmem>>, vector<1x128xf32>
    %cst = arith.constant dense<0.000000e+00> : vector<8x128xf32>
    %12 = tpu.matmul %1, %4, %cst {dimension_numbers = #tpu.dot_dimension_numbers<[1], [1], [0], [0], [0, 0, 1, 0], [], []>} : vector<8x1024xbf16>, vector<128x1024xbf16>, vector<8x128xf32> -> vector<8x128xf32>
    %cst_19 = arith.constant dense<0.000000e+00> : vector<8x128xf32>
    %13 = tpu.matmul %3, %4, %cst_19 {dimension_numbers = #tpu.dot_dimension_numbers<[1], [1], [0], [0], [0, 0, 1, 0], [], []>} : vector<8x1024xbf16>, vector<128x1024xbf16>, vector<8x128xf32> -> vector<8x128xf32>
    %14 = tpu.concatenate %12, %13 in 0 : vector<8x128xf32>, vector<8x128xf32> -> vector<16x128xf32>
    %15 = arith.truncf %14 : vector<16x128xf32> to vector<16x128xbf16>
    %cst_20 = arith.constant dense<0.000000e+00> : vector<16x128xf32>
    %16 = tpu.matmul %15, %5, %cst_20 {dimension_numbers = #tpu.dot_dimension_numbers<[1], [0], [0], [1], [0, 0, 1, 1], [], []>} : vector<16x128xbf16>, vector<128x128xbf16>, vector<16x128xf32> -> vector<16x128xf32>
    %17 = vector.shape_cast %16 : vector<16x128xf32> to vector<2x8x128xf32>
    %cst_21 = arith.constant dense<0.000000e+00> : vector<2x128xf32>
    %18 = vector.multi_reduction <add>, %17, %cst_21 [1] : vector<2x8x128xf32> to vector<2x128xf32>
    %19 = vector.shape_cast %18 : vector<2x128xf32> to vector<2x1x128xf32>
    %20 = arith.mulf %17, %17 : vector<2x8x128xf32>
    %cst_22 = arith.constant dense<0.000000e+00> : vector<2x128xf32>
    %21 = vector.multi_reduction <add>, %20, %cst_22 [1] : vector<2x8x128xf32> to vector<2x128xf32>
    %22 = vector.shape_cast %21 : vector<2x128xf32> to vector<2x1x128xf32>
    %cst_23 = arith.constant 1.250000e-01 : f32
    %23 = vector.broadcast %cst_23 : f32 to vector<2x1x128xf32>
    %24 = arith.mulf %19, %23 : vector<2x1x128xf32>
    %cst_24 = arith.constant 1.250000e-01 : f32
    %25 = vector.broadcast %cst_24 : f32 to vector<2x1x128xf32>
    %26 = arith.mulf %22, %25 : vector<2x1x128xf32>
    %27 = arith.mulf %24, %24 : vector<2x1x128xf32>
    %28 = arith.subf %26, %27 : vector<2x1x128xf32>
    %cst_25 = arith.constant 0.000000e+00 : f32
    %29 = vector.broadcast %cst_25 : f32 to vector<2x1x128xf32>
    %30 = arith.maximumf %28, %29 : vector<2x1x128xf32>
    %cst_26 = arith.constant 9.99999974E-6 : f32
    %31 = vector.broadcast %cst_26 : f32 to vector<2x1x128xf32>
    %32 = arith.addf %30, %31 : vector<2x1x128xf32>
    %33 = math.rsqrt %32 : vector<2x1x128xf32>
    %34 = vector.shape_cast %8 : vector<1x128xf32> to vector<1x1x128xf32>
    %35 = vector.broadcast %34 : vector<1x1x128xf32> to vector<2x1x128xf32>
    %36 = arith.mulf %33, %35 : vector<2x1x128xf32>
    %37 = arith.mulf %24, %36 : vector<2x1x128xf32>
    %38 = vector.shape_cast %9 : vector<1x128xf32> to vector<1x1x128xf32>
    %39 = vector.broadcast %38 : vector<1x1x128xf32> to vector<2x1x128xf32>
    %40 = arith.subf %39, %37 : vector<2x1x128xf32>
    %41 = vector.broadcast %36 : vector<2x1x128xf32> to vector<2x8x128xf32>
    %42 = arith.mulf %17, %41 : vector<2x8x128xf32>
    %43 = vector.broadcast %40 : vector<2x1x128xf32> to vector<2x8x128xf32>
    %44 = arith.addf %42, %43 : vector<2x8x128xf32>
    %cst_27 = arith.constant 0.000000e+00 : f32
    %45 = vector.broadcast %cst_27 : f32 to vector<2x8x128xf32>
    %46 = arith.maximumf %44, %45 : vector<2x8x128xf32>
    %47 = vector.shape_cast %46 : vector<2x8x128xf32> to vector<16x128xf32>
    %48 = arith.truncf %47 : vector<16x128xf32> to vector<16x128xbf16>
    %cst_28 = arith.constant dense<0.000000e+00> : vector<16x128xf32>
    %49 = tpu.matmul %48, %6, %cst_28 {dimension_numbers = #tpu.dot_dimension_numbers<[1], [0], [0], [1], [0, 0, 1, 1], [], []>} : vector<16x128xbf16>, vector<128x128xbf16>, vector<16x128xf32> -> vector<16x128xf32>
    %50 = vector.shape_cast %49 : vector<16x128xf32> to vector<2x8x128xf32>
    %cst_29 = arith.constant dense<0.000000e+00> : vector<2x128xf32>
    %51 = vector.multi_reduction <add>, %50, %cst_29 [1] : vector<2x8x128xf32> to vector<2x128xf32>
    %52 = vector.shape_cast %51 : vector<2x128xf32> to vector<2x1x128xf32>
    %53 = arith.mulf %50, %50 : vector<2x8x128xf32>
    %cst_30 = arith.constant dense<0.000000e+00> : vector<2x128xf32>
    %54 = vector.multi_reduction <add>, %53, %cst_30 [1] : vector<2x8x128xf32> to vector<2x128xf32>
    %55 = vector.shape_cast %54 : vector<2x128xf32> to vector<2x1x128xf32>
    %cst_31 = arith.constant 1.250000e-01 : f32
    %56 = vector.broadcast %cst_31 : f32 to vector<2x1x128xf32>
    %57 = arith.mulf %52, %56 : vector<2x1x128xf32>
    %cst_32 = arith.constant 1.250000e-01 : f32
    %58 = vector.broadcast %cst_32 : f32 to vector<2x1x128xf32>
    %59 = arith.mulf %55, %58 : vector<2x1x128xf32>
    %60 = arith.mulf %57, %57 : vector<2x1x128xf32>
    %61 = arith.subf %59, %60 : vector<2x1x128xf32>
    %cst_33 = arith.constant 0.000000e+00 : f32
    %62 = vector.broadcast %cst_33 : f32 to vector<2x1x128xf32>
    %63 = arith.maximumf %61, %62 : vector<2x1x128xf32>
    %cst_34 = arith.constant 9.99999974E-6 : f32
    %64 = vector.broadcast %cst_34 : f32 to vector<2x1x128xf32>
    %65 = arith.addf %63, %64 : vector<2x1x128xf32>
    %66 = math.rsqrt %65 : vector<2x1x128xf32>
    %67 = vector.shape_cast %10 : vector<1x128xf32> to vector<1x1x128xf32>
    %68 = vector.broadcast %67 : vector<1x1x128xf32> to vector<2x1x128xf32>
    %69 = arith.mulf %66, %68 : vector<2x1x128xf32>
    %70 = arith.mulf %57, %69 : vector<2x1x128xf32>
    %71 = vector.shape_cast %11 : vector<1x128xf32> to vector<1x1x128xf32>
    %72 = vector.broadcast %71 : vector<1x1x128xf32> to vector<2x1x128xf32>
    %73 = arith.subf %72, %70 : vector<2x1x128xf32>
    %74 = vector.broadcast %69 : vector<2x1x128xf32> to vector<2x8x128xf32>
    %75 = arith.mulf %50, %74 : vector<2x8x128xf32>
    %76 = vector.broadcast %73 : vector<2x1x128xf32> to vector<2x8x128xf32>
    %77 = arith.addf %75, %76 : vector<2x8x128xf32>
    %cst_35 = arith.constant 0.000000e+00 : f32
    %78 = vector.broadcast %cst_35 : f32 to vector<2x8x128xf32>
    %79 = arith.maximumf %77, %78 : vector<2x8x128xf32>
    %80 = vector.shape_cast %79 : vector<2x8x128xf32> to vector<16x128xf32>
    %81 = arith.truncf %80 : vector<16x128xf32> to vector<16x128xbf16>
    %cst_36 = arith.constant dense<0.000000e+00> : vector<16x128xf32>
    %82 = tpu.matmul %81, %7, %cst_36 {dimension_numbers = #tpu.dot_dimension_numbers<[1], [0], [0], [1], [0, 0, 1, 1], [], []>} : vector<16x128xbf16>, vector<128x128xbf16>, vector<16x128xf32> -> vector<16x128xf32>
    %83 = vector.shape_cast %82 : vector<16x128xf32> to vector<2x8x128xf32>
    %cst_37 = arith.constant dense<0.000000e+00> : vector<2x128xf32>
    %84 = vector.multi_reduction <add>, %83, %cst_37 [1] : vector<2x8x128xf32> to vector<2x128xf32>
    %85 = vector.shape_cast %84 : vector<2x128xf32> to vector<2x1x128xf32>
    %86 = arith.mulf %83, %83 : vector<2x8x128xf32>
    %cst_38 = arith.constant dense<0.000000e+00> : vector<2x128xf32>
    %87 = vector.multi_reduction <add>, %86, %cst_38 [1] : vector<2x8x128xf32> to vector<2x128xf32>
    %88 = vector.shape_cast %87 : vector<2x128xf32> to vector<2x1x128xf32>
    %cst_39 = arith.constant 1.250000e-01 : f32
    %89 = vector.broadcast %cst_39 : f32 to vector<2x1x128xf32>
    %90 = arith.mulf %85, %89 : vector<2x1x128xf32>
    %cst_40 = arith.constant 1.250000e-01 : f32
    %91 = vector.broadcast %cst_40 : f32 to vector<2x1x128xf32>
    %92 = arith.mulf %88, %91 : vector<2x1x128xf32>
    %93 = arith.mulf %90, %90 : vector<2x1x128xf32>
    %94 = arith.subf %92, %93 : vector<2x1x128xf32>
    %cst_41 = arith.constant 0.000000e+00 : f32
    %95 = vector.broadcast %cst_41 : f32 to vector<2x1x128xf32>
    %96 = arith.maximumf %94, %95 : vector<2x1x128xf32>
    %cst_42 = arith.constant 9.99999974E-6 : f32
    %97 = vector.broadcast %cst_42 : f32 to vector<2x1x128xf32>
    %98 = arith.addf %96, %97 : vector<2x1x128xf32>
    %99 = math.rsqrt %98 : vector<2x1x128xf32>
    %100 = vector.extract_strided_slice %83 {offsets = [0, 0, 0], sizes = [1, 8, 128], strides = [1, 1, 1]} : vector<2x8x128xf32> to vector<1x8x128xf32>
    %101 = vector.shape_cast %100 : vector<1x8x128xf32> to vector<8x128xf32>
    %102 = vector.extract_strided_slice %90 {offsets = [0, 0, 0], sizes = [1, 1, 128], strides = [1, 1, 1]} : vector<2x1x128xf32> to vector<1x1x128xf32>
    %103 = vector.shape_cast %102 : vector<1x1x128xf32> to vector<1x128xf32>
    %104 = vector.broadcast %103 : vector<1x128xf32> to vector<8x128xf32>
    %105 = arith.subf %101, %104 : vector<8x128xf32>
    %106 = vector.extract_strided_slice %99 {offsets = [0, 0, 0], sizes = [1, 1, 128], strides = [1, 1, 1]} : vector<2x1x128xf32> to vector<1x1x128xf32>
    %107 = vector.shape_cast %106 : vector<1x1x128xf32> to vector<1x128xf32>
    %cst_43 = arith.constant 1.250000e-01 : f32
    %108 = vector.broadcast %cst_43 : f32 to vector<1x128xf32>
    %109 = arith.mulf %107, %108 : vector<1x128xf32>
    %110 = vector.broadcast %109 : vector<1x128xf32> to vector<8x128xf32>
    %111 = arith.mulf %105, %110 : vector<8x128xf32>
    %112 = vector.extract_strided_slice %83 {offsets = [1, 0, 0], sizes = [1, 8, 128], strides = [1, 1, 1]} : vector<2x8x128xf32> to vector<1x8x128xf32>
    %113 = vector.shape_cast %112 : vector<1x8x128xf32> to vector<8x128xf32>
    %114 = vector.extract_strided_slice %90 {offsets = [1, 0, 0], sizes = [1, 1, 128], strides = [1, 1, 1]} : vector<2x1x128xf32> to vector<1x1x128xf32>
    %115 = vector.shape_cast %114 : vector<1x1x128xf32> to vector<1x128xf32>
    %116 = vector.broadcast %115 : vector<1x128xf32> to vector<8x128xf32>
    %117 = arith.subf %113, %116 : vector<8x128xf32>
    %118 = vector.extract_strided_slice %99 {offsets = [1, 0, 0], sizes = [1, 1, 128], strides = [1, 1, 1]} : vector<2x1x128xf32> to vector<1x1x128xf32>
    %119 = vector.shape_cast %118 : vector<1x1x128xf32> to vector<1x128xf32>
    %120 = vector.broadcast %119 : vector<1x128xf32> to vector<8x128xf32>
    %121 = arith.mulf %117, %120 : vector<8x128xf32>
    %cst_44 = arith.constant dense<0.000000e+00> : vector<128x128xf32>
    %122 = tpu.matmul %111, %121, %cst_44 {dimension_numbers = #tpu.dot_dimension_numbers<[0], [0], [1], [1], [0, 1, 1, 1], [], []>} : vector<8x128xf32>, vector<8x128xf32>, vector<128x128xf32> -> vector<128x128xf32>
    %123 = tpu.iota {dimensions = array<i32: 0>} : vector<128x128xi32>
    %124 = tpu.iota {dimensions = array<i32: 1>} : vector<128x128xi32>
    %125 = arith.cmpi eq, %123, %124 : vector<128x128xi32>
    %cst_45 = arith.constant 1.000000e+00 : f32
    %126 = vector.broadcast %cst_45 : f32 to vector<128x128xf32>
    %127 = arith.subf %122, %126 : vector<128x128xf32>
    %128 = arith.mulf %127, %127 : vector<128x128xf32>
    %129 = arith.mulf %122, %122 : vector<128x128xf32>
    %cst_46 = arith.constant 5.100000e-03 : f32
    %130 = vector.broadcast %cst_46 : f32 to vector<128x128xf32>
    %131 = arith.mulf %130, %129 : vector<128x128xf32>
    %132 = arith.select %125, %128, %131 : vector<128x128xi1>, vector<128x128xf32>
    %133 = vector.shape_cast %132 : vector<128x128xf32> to vector<1x128x128xf32>
    %cst_47 = arith.constant dense<0.000000e+00> : vector<1xf32>
    %134 = vector.multi_reduction <add>, %133, %cst_47 [1, 2] : vector<1x128x128xf32> to vector<1xf32>
    %135 = vector.shape_cast %134 : vector<1xf32> to vector<1x1x1xf32>
    %136 = vector.extract %135[0, 0, 0] : f32 from vector<1x1x1xf32>
    %c0_48 = arith.constant 0 : index
    %c0_49 = arith.constant 0 : index
    %137 = memref.load %arg10[%c0_48, %c0_49] : memref<1x1xf32, #tpu.memory_space<smem>>
    memref.store %136, %arg10[%c0_48, %c0_49] : memref<1x1xf32, #tpu.memory_space<smem>>
    return
  }
}

</mosaic_0001>

<bundles_post_ra>
// kernel: barlow_twins_loss.1
= control target key start
LH: loop header
LB: loop body
LE: loop exit
PB: predicated region body
PF: predicated region fallthrough
CT: control target
= control target key end

     0   :  { %15 = vsyncpa [#allocation3], 0  ;;  %s2565_s0 = inlined_call_operand.vmem [shape: f32[8,1024], index: 0, kind: input, shape index: {}]   ;;  %s2566_s1 = inlined_call_operand.vmem [shape: f32[8,1024], index: 1, kind: input, shape index: {}]   ;;  %s2567_s2 = inlined_call_operand.vmem [shape: bf16[128,1024], index: 2, kind: input, shape index: {}]   ;;  %s2568_s3 = inlined_call_operand.vmem [shape: bf16[128,128], index: 3, kind: input, shape index: {}]   ;;  %s2569_s4 = inlined_call_operand.vmem [shape: f32[1,128], index: 4, kind: input, shape index: {}]   ;;  %s2570_s5 = inlined_call_operand.vmem [shape: f32[1,128], index: 5, kind: input, shape index: {}]   ;;  %s2571_s6 = inlined_call_operand.vmem [shape: bf16[128,128], index: 6, kind: input, shape index: {}]   ;;  %s2572_s7 = inlined_call_operand.vmem [shape: f32[1,128], index: 7, kind: input, shape index: {}]   ;;  %s2573_s8 = inlined_call_operand.hbm [shape: f32[1,128], index: 8, kind: input, shape index: {}]   ;;  %s2574_s9 = inlined_call_operand.hbm [shape: bf16[128,128], index: 9, kind: input, shape index: {}]   ;;  %s2575_s10 = inlined_call_operand.hbm [shape: f32[1,1], index: 10, kind: output, shape index: {}]  }
   0x1   :  { %16 = vsyncpa [#allocation6], 0 }
   0x2   :  { %17 = vsyncpa [#allocation4], 0  ;;  %s2071_s13 = smov [#allocation2]   ;;  %s2072_s15 = smov [#allocation5]  }
   0x3   :  { %s40_s14 = sshll.u32 %s2071_s13, 4  ;;  %s49_s16 = sshll.u32 %s2072_s15, 4  ;;  %s41_s14 = int_to_ptr.vmem [resolvable:$true] %s40_s14  ;;  %s2133_s16 = int_to_ptr.vmem [resolvable:$true] %s49_s16 }
   0x4   :  { %s2011_s19 = scalar_lea.hbm %s2573_s8, 16 }
   0x5   :  { %p2012_p0 = scmp.ne.s32.totalorder %s2573_s8, %s2011_s19  ;;  %p2015_p1 = scmp.lt.u32.totalorder %s2011_s19, %s2573_s8 }
   0x7   :  { %p2017_p2 = pnand %p2015_p1, %p2012_p0 }
   0x9   :  { %2020 = shalt.err (!%p2017_p2)
}
   0xa   :  { %s2021_s24 = scalar_lea.vmem %s41_s14, 16  ;;  %s2025_s25 = scalar_lea.vmem %s41_s14, 32 }
   0xb   :  { %p2022_p3 = scmp.ne.s32.totalorder %s41_s14, %s2021_s24  ;;  %p2026_p4 = scmp.lt.s32.totalorder %s41_s14, %s41_s14 }
   0xc   :  { %p2027_p5 = scmp.lt.s32.totalorder %s2025_s25, %s2021_s24 }
   0xe   :  { %p2028_p6 = por %p2027_p5, %p2026_p4 }
  0x10   :  { %p2029_p7 = pnand %p2028_p6, %p2022_p3 }
  0x12   :  { %2032 = shalt.err (!%p2029_p7)
}
  0x13   :  { %43 = dma.hbm_to_vmem [thread:$0]  %s2573_s8, 16, %s41_s14, [#allocation3]  }
  0x14   :  { %s2033_s30 = scalar_lea.hbm %s2574_s9, 1024 }
  0x15   :  { %p2034_p8 = scmp.ne.s32.totalorder %s2574_s9, %s2033_s30  ;;  %p2037_p9 = scmp.lt.u32.totalorder %s2033_s30, %s2574_s9 }
  0x17   :  { %p2039_p10 = pnand %p2037_p9, %p2034_p8 }
  0x19   :  { %2042 = shalt.err (!%p2039_p10)
}
  0x1a   :  { %s2043_s17 = scalar_lea.vmem %s2133_s16, 1024  ;;  %p2048_p12 = scmp.lt.s32.totalorder %s2133_s16, %s2133_s16 }
  0x1b   :  { %p2044_p11 = scmp.ne.s32.totalorder %s2133_s16, %s2043_s17  ;;  %p2049_p13 = scmp.lt.s32.totalorder %s2043_s17, %s2043_s17 }
  0x1d   :  { %p2050_p0 = por %p2049_p13, %p2048_p12 }
  0x1f   :  { %p2051_p1 = pnand %p2050_p0, %p2044_p11 }
  0x21   :  { %2054 = shalt.err (!%p2051_p1)
}
  0x22   :  { %s2073_s8 = smov 64   ;;  %s2074_s14 = smov 4  }
  0x23   :  { %55 = dma.hbm_to_vmem [thread:$0]  %s2574_s9, 1024, %s2133_s16, [#allocation6], %s2073_s8, %s2073_s8, %s2074_s14  }
  0x24   :  { %2065 = dma.done.wait [#allocation3], 16  }
  0x25   :  { %2066 = vsyncadd [#allocation3], 4294967280 }
  0x26   :  { %2067 = dma.done.wait [#allocation6], 1024  }
  0x27   :  { %2068 = vsyncadd [#allocation6], 4294966272  ;;  %v95_v0 = vld [vmem:[%s2567_s2] sm:$0xff]  ;;  %v64_v7 = vld [vmem:[%s2565_s0 + $0x8] sm:$0xff]  ;;  %vm2076_vm0 = vmmov 0   ;;  %vm1342_vm1 = vcmask 64512  }
  0x28   :  { %v99_v1 = vld [vmem:[%s2567_s2 + $0x20] sm:$0xff]  ;;  %v72_v10 = vpack.c.bf16 %v64_v7, %v64_v7  ;;  %v80_v11 = vld [vmem:[%s2566_s1 + $0x8] sm:$0xff]  ;;  %v66_v45 = vld [vmem:[%s2565_s0 + $0x18] sm:$0xff]  ;;  %s2055_s12 = scalar_lea.hbm %s2575_s10, 16 }
  0x29   :  { %v103_v2 = vld [vmem:[%s2567_s2 + $0x40] sm:$0xff]  ;;  %v1693_v3 = vcombine.high %v95_v0, %v99_v1  ;;  %v1692_v4 = vcombine.low %v95_v0, %v99_v1  ;;  %v88_v12 = vpack.c.bf16 %v80_v11, %v80_v11  ;;  %v96_v35 = vld [vmem:[%s2567_s2 + $0x8] sm:$0xff]  ;;  %v82_v46 = vld [vmem:[%s2566_s1 + $0x18] sm:$0xff]  ;;  %v74_v49 = vpack.c.bf16 %v66_v45, %v66_v45  ;;  %p2056_p2 = scmp.ne.s32.totalorder %s2575_s10, %s2055_s12  ;;  %p2059_p3 = scmp.lt.u32.totalorder %s2055_s12, %s2575_s10 }
  0x2a   :  { %v107_v5 = vld [vmem:[%s2567_s2 + $0x60] sm:$0xff]  ;;  %563 = vmatprep.mubr.bf16.mxu0 %v72_v10  ;;  %v100_v36 = vld [vmem:[%s2567_s2 + $0x28] sm:$0xff]  ;;  %v90_v50 = vpack.c.bf16 %v82_v46, %v82_v46  ;;  %v97_v11 = vld [vmem:[%s2567_s2 + $0x10] sm:$0xff] }
  0x2b   :  { %v1701_v6 = vcombine.high %v103_v2, %v107_v5  ;;  %531 = vmatprep.subr.bf16.mxu0 %v1693_v3  ;;  %691 = vmatprep.subr.bf16.mxu1 %v1693_v3  ;;  %v111_v8 = vld [vmem:[%s2567_s2 + $0x80] sm:$0xff]  ;;  %v1700_v13 = vcombine.low %v103_v2, %v107_v5  ;;  %v1695_v38 = vcombine.high %v96_v35, %v100_v36  ;;  %v104_v41 = vld [vmem:[%s2567_s2 + $0x48] sm:$0xff]  ;;  %p2061_p4 = pnand %p2059_p3, %p2056_p2 }
  0x2c   :  { %532 = vmatpush1.bf16.xpose.msra.mxu0 %v1692_v4  ;;  %692 = vmatpush1.bf16.xpose.msra.mxu1 %v1692_v4  ;;  %v115_v9 = vld [vmem:[%s2567_s2 + $0xa0] sm:$0xff]  ;;  %v108_v42 = vld [vmem:[%s2567_s2 + $0x68] sm:$0xff]  ;;  %v1694_v47 = vcombine.low %v96_v35, %v100_v36  ;;  %v129_v35 = vld [vmem:[%s2567_s2 + $0x110] sm:$0xff] }
  0x2d   :  { %533 = vmatprep.subr.bf16.mxu0 %v1701_v6  ;;  %693 = vmatprep.subr.bf16.mxu1 %v1701_v6  ;;  %v1709_v14 = vcombine.high %v111_v8, %v115_v9  ;;  %v119_v15 = vld [vmem:[%s2567_s2 + $0xc0] sm:$0xff]  ;;  %v1708_v17 = vcombine.low %v111_v8, %v115_v9  ;;  %v1703_v48 = vcombine.high %v104_v41, %v108_v42  ;;  %v112_v51 = vld [vmem:[%s2567_s2 + $0x88] sm:$0xff]  ;;  %v133_v36 = vld [vmem:[%s2567_s2 + $0x130] sm:$0xff] }
  0x2e   :  { %723 = vmatprep.mubr.bf16.mxu1 %v88_v12  ;;  %v123_v16 = vld [vmem:[%s2567_s2 + $0xe0] sm:$0xff]  ;;  %v116_v52 = vld [vmem:[%s2567_s2 + $0xa8] sm:$0xff]  ;;  %v1702_v53 = vcombine.low %v104_v41, %v108_v42  ;;  %v101_v12 = vld [vmem:[%s2567_s2 + $0x30] sm:$0xff]  ;;  %v1728_v41 = vcombine.low %v129_v35, %v133_v36 }
  0x2f   :  { %v1717_v18 = vcombine.high %v119_v15, %v123_v16  ;;  %v127_v19 = vld [vmem:[%s2567_s2 + $0x100] sm:$0xff]  ;;  %v1716_v21 = vcombine.low %v119_v15, %v123_v16  ;;  %v1711_v54 = vcombine.high %v112_v51, %v116_v52  ;;  %v120_v55 = vld [vmem:[%s2567_s2 + $0xc8] sm:$0xff]  ;;  %v1710_v57 = vcombine.low %v112_v51, %v116_v52  ;;  %v65_v15 = vld [vmem:[%s2565_s0 + $0x10] sm:$0xff] }
  0x30   :  { %v131_v20 = vld [vmem:[%s2567_s2 + $0x120] sm:$0xff]  ;;  %v124_v56 = vld [vmem:[%s2567_s2 + $0xe8] sm:$0xff]  ;;  %v81_v16 = vld [vmem:[%s2566_s1 + $0x10] sm:$0xff] }
  0x31   :  { %v1725_v22 = vcombine.high %v127_v19, %v131_v20  ;;  %v135_v23 = vld [vmem:[%s2567_s2 + $0x140] sm:$0xff]  ;;  %v1724_v25 = vcombine.low %v127_v19, %v131_v20  ;;  %v1719_v58 = vcombine.high %v120_v55, %v124_v56  ;;  %v128_v59 = vld [vmem:[%s2567_s2 + $0x108] sm:$0xff]  ;;  %v1718_v61 = vcombine.low %v120_v55, %v124_v56  ;;  %v98_v51 = vld [vmem:[%s2567_s2 + $0x18] sm:$0xff] }
  0x32   :  { %v139_v24 = vld [vmem:[%s2567_s2 + $0x160] sm:$0xff]  ;;  %v132_v60 = vld [vmem:[%s2567_s2 + $0x128] sm:$0xff]  ;;  %v73_v19 = vpack.c.bf16 %v65_v15, %v65_v15  ;;  %v89_v20 = vpack.c.bf16 %v81_v16, %v81_v16  ;;  %v102_v52 = vld [vmem:[%s2567_s2 + $0x38] sm:$0xff] }
  0x33   :  { %v1733_v26 = vcombine.high %v135_v23, %v139_v24  ;;  %v143_v27 = vld [vmem:[%s2567_s2 + $0x180] sm:$0xff]  ;;  %v1732_v29 = vcombine.low %v135_v23, %v139_v24  ;;  %v1727_v62 = vcombine.high %v128_v59, %v132_v60  ;;  %v136_v63 = vld [vmem:[%s2567_s2 + $0x148] sm:$0xff]  ;;  %v1726_v1 = vcombine.low %v128_v59, %v132_v60  ;;  %v138_v15 = vld [vmem:[%s2567_s2 + $0x158] sm:$0xff] }
  0x34   :  { %534 = vmatpush1.bf16.xpose.msra.mxu0 %v1700_v13  ;;  %694 = vmatpush1.bf16.xpose.msra.mxu1 %v1700_v13  ;;  %v147_v28 = vld [vmem:[%s2567_s2 + $0x1a0] sm:$0xff]  ;;  %v140_v0 = vld [vmem:[%s2567_s2 + $0x168] sm:$0xff]  ;;  %v1696_v23 = vcombine.low %v97_v11, %v101_v12  ;;  %v142_v16 = vld [vmem:[%s2567_s2 + $0x178] sm:$0xff] }
  0x35   :  { %535 = vmatprep.subr.bf16.mxu0 %v1709_v14  ;;  %695 = vmatprep.subr.bf16.mxu1 %v1709_v14  ;;  %v1741_v30 = vcombine.high %v143_v27, %v147_v28  ;;  %v151_v31 = vld [vmem:[%s2567_s2 + $0x1c0] sm:$0xff]  ;;  %v1740_v33 = vcombine.low %v143_v27, %v147_v28  ;;  %v1735_v2 = vcombine.high %v136_v63, %v140_v0  ;;  %v144_v3 = vld [vmem:[%s2567_s2 + $0x188] sm:$0xff]  ;;  %v113_v27 = vld [vmem:[%s2567_s2 + $0x90] sm:$0xff] }
  0x36   :  { %v155_v32 = vld [vmem:[%s2567_s2 + $0x1e0] sm:$0xff]  ;;  %v148_v4 = vld [vmem:[%s2567_s2 + $0x1a8] sm:$0xff]  ;;  %v1734_v5 = vcombine.low %v136_v63, %v140_v0  ;;  %v1697_v14 = vcombine.high %v97_v11, %v101_v12  ;;  %v117_v28 = vld [vmem:[%s2567_s2 + $0xb0] sm:$0xff]  ;;  %v1698_v63 = vcombine.low %v98_v51, %v102_v52 }
  0x37   :  { %v1749_v34 = vcombine.high %v151_v31, %v155_v32  ;;  %v1748_v37 = vcombine.low %v151_v31, %v155_v32  ;;  %v63_v39 = vld [vmem:[%s2565_s0] sm:$0xff]  ;;  %v1743_v6 = vcombine.high %v144_v3, %v148_v4  ;;  %v152_v7 = vld [vmem:[%s2567_s2 + $0x1c8] sm:$0xff]  ;;  %v1742_v9 = vcombine.low %v144_v3, %v148_v4  ;;  %v121_v31 = vld [vmem:[%s2567_s2 + $0xd0] sm:$0xff] }
  0x38   :  { %v79_v40 = vld [vmem:[%s2566_s1] sm:$0xff]  ;;  %v71_v43 = vpack.c.bf16 %v63_v39, %v63_v39  ;;  %v156_v8 = vld [vmem:[%s2567_s2 + $0x1e8] sm:$0xff]  ;;  %v125_v32 = vld [vmem:[%s2567_s2 + $0xf0] sm:$0xff] }
  0x39   :  { %v87_v44 = vpack.c.bf16 %v79_v40, %v79_v40  ;;  %v1751_v10 = vcombine.high %v152_v7, %v156_v8  ;;  %v1750_v13 = vcombine.low %v152_v7, %v156_v8  ;;  %v137_v39 = vld [vmem:[%s2567_s2 + $0x150] sm:$0xff]  ;;  %v67_v55 = vld [vmem:[%s2565_s0 + $0x20] sm:$0xff]  ;;  %v114_v3 = vld [vmem:[%s2567_s2 + $0x98] sm:$0xff] }
  0x3a   :  { %v141_v40 = vld [vmem:[%s2567_s2 + $0x170] sm:$0xff]  ;;  %v83_v56 = vld [vmem:[%s2566_s1 + $0x20] sm:$0xff]  ;;  %v75_v59 = vpack.c.bf16 %v67_v55, %v67_v55  ;;  %v118_v4 = vld [vmem:[%s2567_s2 + $0xb8] sm:$0xff] }
  0x3b   :  { %v1737_v42 = vcombine.high %v137_v39, %v141_v40  ;;  %v1736_v45 = vcombine.low %v137_v39, %v141_v40  ;;  %v91_v60 = vpack.c.bf16 %v83_v56, %v83_v56  ;;  %v122_v7 = vld [vmem:[%s2567_s2 + $0xd8] sm:$0xff]  ;;  %v1981_v39 = vld [vmem:[%s2568_s3 + $0x30] sm:$0xff]   ;;  %v1988_v55 = vld [vmem:[%s2571_s6 + $0x28] sm:$0xff]  }
  0x3c   :  { %536 = vmatpush1.bf16.xpose.msra.mxu0 %v1708_v17  ;;  %696 = vmatpush1.bf16.xpose.msra.mxu1 %v1708_v17  ;;  %v105_v17 = vld [vmem:[%s2567_s2 + $0x50] sm:$0xff]  ;;  %v126_v8 = vld [vmem:[%s2567_s2 + $0xf8] sm:$0xff] }
  0x3d   :  { %537 = vmatprep.subr.bf16.mxu0 %v1717_v18  ;;  %697 = vmatprep.subr.bf16.mxu1 %v1717_v18  ;;  %v109_v18 = vld [vmem:[%s2567_s2 + $0x70] sm:$0xff]  ;;  %v130_v11 = vld [vmem:[%s2567_s2 + $0x118] sm:$0xff] }
  0x3e   :  { %v1705_v24 = vcombine.high %v105_v17, %v109_v18  ;;  %v134_v12 = vld [vmem:[%s2567_s2 + $0x138] sm:$0xff]  ;;  %v1989_v56 = vld [vmem:[%s2571_s6 + $0x30] sm:$0xff]  }
  0x3f   :  { %v1982_v40 = vld [vmem:[%s2568_s3 + $0x38] sm:$0xff]  }
  0x44   :  { %538 = vmatpush1.bf16.xpose.msra.mxu0 %v1716_v21  ;;  %698 = vmatpush1.bf16.xpose.msra.mxu1 %v1716_v21  ;;  %v68_v21 = vld [vmem:[%s2565_s0 + $0x28] sm:$0xff] }
  0x45   :  { %539 = vmatprep.subr.bf16.mxu0 %v1725_v22  ;;  %699 = vmatprep.subr.bf16.mxu1 %v1725_v22  ;;  %v84_v22 = vld [vmem:[%s2566_s1 + $0x28] sm:$0xff] }
  0x4c   :  { %540 = vmatpush1.bf16.xpose.msra.mxu0 %v1724_v25  ;;  %700 = vmatpush1.bf16.xpose.msra.mxu1 %v1724_v25  ;;  %v76_v25 = vpack.c.bf16 %v68_v21, %v68_v21  ;;  %v1738_v21 = vcombine.low %v138_v15, %v142_v16 }
  0x4d   :  { %541 = vmatprep.subr.bf16.mxu0 %v1733_v26  ;;  %701 = vmatprep.subr.bf16.mxu1 %v1733_v26  ;;  %v92_v26 = vpack.c.bf16 %v84_v22, %v84_v22 }
  0x54   :  { %542 = vmatpush1.bf16.xpose.msra.mxu0 %v1732_v29  ;;  %702 = vmatpush1.bf16.xpose.msra.mxu1 %v1732_v29  ;;  %v1704_v29 = vcombine.low %v105_v17, %v109_v18  ;;  %v1730_v17 = vcombine.low %v130_v11, %v134_v12  ;;  %v1739_v18 = vcombine.high %v138_v15, %v142_v16 }
  0x55   :  { %543 = vmatprep.subr.bf16.mxu0 %v1741_v30  ;;  %703 = vmatprep.subr.bf16.mxu1 %v1741_v30  ;;  %v1713_v30 = vcombine.high %v113_v27, %v117_v28 }
  0x5c   :  { %544 = vmatpush1.bf16.xpose.msra.mxu0 %v1740_v33  ;;  %704 = vmatpush1.bf16.xpose.msra.mxu1 %v1740_v33  ;;  %v1712_v33 = vcombine.low %v113_v27, %v117_v28  ;;  %v69_v28 = vld [vmem:[%s2565_s0 + $0x30] sm:$0xff] }
  0x5d   :  { %545 = vmatprep.subr.bf16.mxu0 %v1749_v34  ;;  %705 = vmatprep.subr.bf16.mxu1 %v1749_v34  ;;  %v1721_v34 = vcombine.high %v121_v31, %v125_v32 }
  0x64   :  { %546 = vmatpush1.bf16.xpose.msra.mxu0 %v1748_v37  ;;  %706 = vmatpush1.bf16.xpose.msra.mxu1 %v1748_v37  ;;  %v1720_v37 = vcombine.low %v121_v31, %v125_v32  ;;  %v77_v31 = vpack.c.bf16 %v69_v28, %v69_v28 }
  0x65   :  { %571 = vmatprep.subr.bf16.mxu0 %v1695_v38  ;;  %731 = vmatprep.subr.bf16.mxu1 %v1695_v38  ;;  %v1729_v38 = vcombine.high %v129_v35, %v133_v36  ;;  %v1977_v35 = vld [vmem:[%s2568_s3 + $0x10] sm:$0xff]   ;;  %v1978_v36 = vld [vmem:[%s2568_s3 + $0x18] sm:$0xff]  }
  0x6b   :  { %564 = vmatmul.mubr.bf16.vlgmr.msra.gmra.mrb[0].mxu0 %v71_v43  ;;  %724 = vmatmul.mubr.bf16.vlgmr.msra.gmra.mrb[0].mxu1 %v87_v44  ;;  %v145_v43 = vld [vmem:[%s2567_s2 + $0x190] sm:$0xff] }
  0x6c   :  { %572 = vmatpush1.bf16.xpose.msra.mxu0 %v1694_v47  ;;  %732 = vmatpush1.bf16.xpose.msra.mxu1 %v1694_v47  ;;  %v149_v44 = vld [vmem:[%s2567_s2 + $0x1b0] sm:$0xff] }
  0x6d   :  { %573 = vmatprep.subr.bf16.mxu0 %v1703_v48  ;;  %733 = vmatprep.subr.bf16.mxu1 %v1703_v48  ;;  %v1745_v46 = vcombine.high %v145_v43, %v149_v44  ;;  %v153_v47 = vld [vmem:[%s2567_s2 + $0x1d0] sm:$0xff] }
  0x6e   :  { %603 = vmatprep.mubr.bf16.mxu0 %v74_v49  ;;  %763 = vmatprep.mubr.bf16.mxu1 %v90_v50  ;;  %v157_v48 = vld [vmem:[%s2567_s2 + $0x1f0] sm:$0xff]  ;;  %v1744_v49 = vcombine.low %v145_v43, %v149_v44 }
  0x6f   :  { %v1753_v50 = vcombine.high %v153_v47, %v157_v48 }
  0x74   :  { %574 = vmatpush1.bf16.xpose.msra.mxu0 %v1702_v53  ;;  %734 = vmatpush1.bf16.xpose.msra.mxu1 %v1702_v53  ;;  %v1752_v53 = vcombine.low %v153_v47, %v157_v48 }
  0x75   :  { %575 = vmatprep.subr.bf16.mxu0 %v1711_v54  ;;  %735 = vmatprep.subr.bf16.mxu1 %v1711_v54  ;;  %v1699_v54 = vcombine.high %v98_v51, %v102_v52  ;;  %v1984_v51 = vld [vmem:[%s2571_s6 + $0x8] sm:$0xff]   ;;  %v1985_v52 = vld [vmem:[%s2571_s6 + $0x10] sm:$0xff]  }
  0x7c   :  { %576 = vmatpush1.bf16.xpose.msra.mxu0 %v1710_v57  ;;  %736 = vmatpush1.bf16.xpose.msra.mxu1 %v1710_v57  ;;  %v106_v57 = vld [vmem:[%s2567_s2 + $0x58] sm:$0xff] }
  0x7d   :  { %577 = vmatprep.subr.bf16.mxu0 %v1719_v58  ;;  %737 = vmatprep.subr.bf16.mxu1 %v1719_v58  ;;  %v110_v58 = vld [vmem:[%s2567_s2 + $0x78] sm:$0xff] }
  0x7e   :  { %v1707_v0 = vcombine.high %v106_v57, %v110_v58 }
  0x84   :  { %578 = vmatpush1.bf16.xpose.msra.mxu0 %v1718_v61  ;;  %738 = vmatpush1.bf16.xpose.msra.mxu1 %v1718_v61  ;;  %v70_v61 = vld [vmem:[%s2565_s0 + $0x38] sm:$0xff] }
  0x85   :  { %579 = vmatprep.subr.bf16.mxu0 %v1727_v62  ;;  %739 = vmatprep.subr.bf16.mxu1 %v1727_v62  ;;  %v86_v62 = vld [vmem:[%s2566_s1 + $0x38] sm:$0xff] }
  0x8c   :  { %580 = vmatpush1.bf16.xpose.msra.mxu0 %v1726_v1  ;;  %740 = vmatpush1.bf16.xpose.msra.mxu1 %v1726_v1  ;;  %v78_v1 = vpack.c.bf16 %v70_v61, %v70_v61 }
  0x8d   :  { %581 = vmatprep.subr.bf16.mxu0 %v1735_v2  ;;  %741 = vmatprep.subr.bf16.mxu1 %v1735_v2  ;;  %v94_v2 = vpack.c.bf16 %v86_v62, %v86_v62 }
  0x94   :  { %582 = vmatpush1.bf16.xpose.msra.mxu0 %v1734_v5  ;;  %742 = vmatpush1.bf16.xpose.msra.mxu1 %v1734_v5  ;;  %v1706_v5 = vcombine.low %v106_v57, %v110_v58  ;;  %v1990_v57 = vld [vmem:[%s2571_s6 + $0x38] sm:$0xff]  }
  0x95   :  { %583 = vmatprep.subr.bf16.mxu0 %v1743_v6  ;;  %743 = vmatprep.subr.bf16.mxu1 %v1743_v6  ;;  %v1715_v6 = vcombine.high %v114_v3, %v118_v4 }
  0x9c   :  { %584 = vmatpush1.bf16.xpose.msra.mxu0 %v1742_v9  ;;  %744 = vmatpush1.bf16.xpose.msra.mxu1 %v1742_v9  ;;  %v1714_v9 = vcombine.low %v114_v3, %v118_v4 }
  0x9d   :  { %585 = vmatprep.subr.bf16.mxu0 %v1751_v10  ;;  %745 = vmatprep.subr.bf16.mxu1 %v1751_v10  ;;  %v1723_v10 = vcombine.high %v122_v7, %v126_v8 }
  0xa4   :  { %586 = vmatpush1.bf16.xpose.msra.mxu0 %v1750_v13  ;;  %746 = vmatpush1.bf16.xpose.msra.mxu1 %v1750_v13  ;;  %v1722_v13 = vcombine.low %v122_v7, %v126_v8 }
  0xa5   :  { %611 = vmatprep.subr.bf16.mxu0 %v1697_v14  ;;  %771 = vmatprep.subr.bf16.mxu1 %v1697_v14  ;;  %v1731_v14 = vcombine.high %v130_v11, %v134_v12 }
  0xab   :  { %604 = vmatmul.mubr.bf16.vlgmr.msra.gmra.mrb[0].mxu0 %v73_v19  ;;  %764 = vmatmul.mubr.bf16.vlgmr.msra.gmra.mrb[0].mxu1 %v89_v20  ;;  %v146_v19 = vld [vmem:[%s2567_s2 + $0x198] sm:$0xff] }
  0xac   :  { %612 = vmatpush1.bf16.xpose.msra.mxu0 %v1696_v23  ;;  %772 = vmatpush1.bf16.xpose.msra.mxu1 %v1696_v23  ;;  %v150_v20 = vld [vmem:[%s2567_s2 + $0x1b8] sm:$0xff] }
  0xad   :  { %613 = vmatprep.subr.bf16.mxu0 %v1705_v24  ;;  %773 = vmatprep.subr.bf16.mxu1 %v1705_v24  ;;  %v1747_v22 = vcombine.high %v146_v19, %v150_v20  ;;  %v154_v23 = vld [vmem:[%s2567_s2 + $0x1d8] sm:$0xff] }
  0xae   :  { %643 = vmatprep.mubr.bf16.mxu0 %v76_v25  ;;  %803 = vmatprep.mubr.bf16.mxu1 %v92_v26  ;;  %v158_v24 = vld [vmem:[%s2567_s2 + $0x1f8] sm:$0xff]  ;;  %v1746_v25 = vcombine.low %v146_v19, %v150_v20 }
  0xaf   :  { %v1755_v26 = vcombine.high %v154_v23, %v158_v24  ;;  %v1754_v27 = vcombine.low %v154_v23, %v158_v24 }
  0xb4   :  { %614 = vmatpush1.bf16.xpose.msra.mxu0 %v1704_v29  ;;  %774 = vmatpush1.bf16.xpose.msra.mxu1 %v1704_v29  ;;  %v85_v29 = vld [vmem:[%s2566_s1 + $0x30] sm:$0xff] }
  0xb5   :  { %615 = vmatprep.subr.bf16.mxu0 %v1713_v30  ;;  %775 = vmatprep.subr.bf16.mxu1 %v1713_v30  ;;  %v2075_v30 = vmov 0.0   ;;  %v93_v32 = vpack.c.bf16 %v85_v29, %v85_v29 }
  0xbc   :  { %616 = vmatpush1.bf16.xpose.msra.mxu0 %v1712_v33  ;;  %776 = vmatpush1.bf16.xpose.msra.mxu1 %v1712_v33  ;;  %v1975_v33 = vld [vmem:[%s2568_s3] sm:$0xff]  }
  0xbd   :  { %617 = vmatprep.subr.bf16.mxu0 %v1721_v34  ;;  %777 = vmatprep.subr.bf16.mxu1 %v1721_v34  ;;  %v1976_v34 = vld [vmem:[%s2568_s3 + $0x8] sm:$0xff]  }
  0xc4   :  { %618 = vmatpush1.bf16.xpose.msra.mxu0 %v1720_v37  ;;  %778 = vmatpush1.bf16.xpose.msra.mxu1 %v1720_v37  ;;  %v1979_v37 = vld [vmem:[%s2568_s3 + $0x20] sm:$0xff]  }
  0xc5   :  { %619 = vmatprep.subr.bf16.mxu0 %v1729_v38  ;;  %779 = vmatprep.subr.bf16.mxu1 %v1729_v38  ;;  %v1980_v38 = vld [vmem:[%s2568_s3 + $0x28] sm:$0xff]  }
  0xcc   :  { %620 = vmatpush1.bf16.xpose.msra.mxu0 %v1728_v41  ;;  %780 = vmatpush1.bf16.xpose.msra.mxu1 %v1728_v41 }
  0xcd   :  { %621 = vmatprep.subr.bf16.mxu0 %v1737_v42  ;;  %781 = vmatprep.subr.bf16.mxu1 %v1737_v42 }
  0xd4   :  { %622 = vmatpush1.bf16.xpose.msra.mxu0 %v1736_v45  ;;  %782 = vmatpush1.bf16.xpose.msra.mxu1 %v1736_v45 }
  0xd5   :  { %623 = vmatprep.subr.bf16.mxu0 %v1745_v46  ;;  %783 = vmatprep.subr.bf16.mxu1 %v1745_v46 }
  0xdc   :  { %624 = vmatpush1.bf16.xpose.msra.mxu0 %v1744_v49  ;;  %784 = vmatpush1.bf16.xpose.msra.mxu1 %v1744_v49 }
  0xdd   :  { %625 = vmatprep.subr.bf16.mxu0 %v1753_v50  ;;  %785 = vmatprep.subr.bf16.mxu1 %v1753_v50  ;;  %v1983_v50 = vld [vmem:[%s2571_s6] sm:$0xff]  }
  0xe4   :  { %626 = vmatpush1.bf16.xpose.msra.mxu0 %v1752_v53  ;;  %786 = vmatpush1.bf16.xpose.msra.mxu1 %v1752_v53  ;;  %v1986_v53 = vld [vmem:[%s2571_s6 + $0x18] sm:$0xff]  }
  0xe5   :  { %651 = vmatprep.subr.bf16.mxu0 %v1699_v54  ;;  %811 = vmatprep.subr.bf16.mxu1 %v1699_v54  ;;  %v1987_v54 = vld [vmem:[%s2571_s6 + $0x20] sm:$0xff]  }
  0xeb   :  { %644 = vmatmul.mubr.bf16.vlgmr.msra.gmra.mrb[0].mxu0 %v75_v59  ;;  %804 = vmatmul.mubr.bf16.vlgmr.msra.gmra.mrb[0].mxu1 %v91_v60 }
  0xec   :  { %652 = vmatpush1.bf16.xpose.msra.mxu0 %v1698_v63  ;;  %812 = vmatpush1.bf16.xpose.msra.mxu1 %v1698_v63 }
  0xed   :  { %653 = vmatprep.subr.bf16.mxu0 %v1707_v0  ;;  %813 = vmatprep.subr.bf16.mxu1 %v1707_v0 }
  0xee   :  { %683 = vmatprep.mubr.bf16.mxu0 %v78_v1  ;;  %843 = vmatprep.mubr.bf16.mxu1 %v94_v2 }
  0xf4   :  { %654 = vmatpush1.bf16.xpose.msra.mxu0 %v1706_v5  ;;  %814 = vmatpush1.bf16.xpose.msra.mxu1 %v1706_v5 }
  0xf5   :  { %655 = vmatprep.subr.bf16.mxu0 %v1715_v6  ;;  %815 = vmatprep.subr.bf16.mxu1 %v1715_v6 }
  0xfc   :  { %656 = vmatpush1.bf16.xpose.msra.mxu0 %v1714_v9  ;;  %816 = vmatpush1.bf16.xpose.msra.mxu1 %v1714_v9 }
  0xfd   :  { %657 = vmatprep.subr.bf16.mxu0 %v1723_v10  ;;  %817 = vmatprep.subr.bf16.mxu1 %v1723_v10 }
 0x104   :  { %658 = vmatpush1.bf16.xpose.msra.mxu0 %v1722_v13  ;;  %818 = vmatpush1.bf16.xpose.msra.mxu1 %v1722_v13 }
 0x105   :  { %659 = vmatprep.subr.bf16.mxu0 %v1731_v14  ;;  %819 = vmatprep.subr.bf16.mxu1 %v1731_v14 }
 0x10c   :  { %660 = vmatpush1.bf16.xpose.msra.mxu0 %v1730_v17  ;;  %820 = vmatpush1.bf16.xpose.msra.mxu1 %v1730_v17 }
 0x10d   :  { %661 = vmatprep.subr.bf16.mxu0 %v1739_v18  ;;  %821 = vmatprep.subr.bf16.mxu1 %v1739_v18 }
 0x114   :  { %662 = vmatpush1.bf16.xpose.msra.mxu0 %v1738_v21  ;;  %822 = vmatpush1.bf16.xpose.msra.mxu1 %v1738_v21 }
 0x115   :  { %663 = vmatprep.subr.bf16.mxu0 %v1747_v22  ;;  %823 = vmatprep.subr.bf16.mxu1 %v1747_v22 }
 0x11c   :  { %664 = vmatpush1.bf16.xpose.msra.mxu0 %v1746_v25  ;;  %824 = vmatpush1.bf16.xpose.msra.mxu1 %v1746_v25 }
 0x11d   :  { %665 = vmatprep.subr.bf16.mxu0 %v1755_v26  ;;  %825 = vmatprep.subr.bf16.mxu1 %v1755_v26 }
 0x124   :  { %666 = vmatpush1.bf16.xpose.msra.mxu0 %v1754_v27  ;;  %826 = vmatpush1.bf16.xpose.msra.mxu1 %v1754_v27 }
 0x125   :  { %1856 = vmatprep.subr.bf16.mxu0 %v2075_v30  ;;  %1876 = vmatprep.subr.bf16.mxu1 %v2075_v30 }
 0x12b   :  { %684 = vmatmul.mubr.bf16.vlgmr.msra.gmra.mrb[0].mxu0 %v77_v31  ;;  %844 = vmatmul.mubr.bf16.vlgmr.msra.gmra.mrb[0].mxu1 %v93_v32 }
 0x12c   :  { %1857 = vmatpush3.bf16.msra.mxu0 %v1975_v33  ;;  %1872 = vmatprep.mubr.msk.bf16.mxu0 %vm2076_vm0, %v2075_v30 }
 0x12d   :  { %1858 = vmatprep.subr.bf16.mxu0 %v2075_v30  ;;  %1892 = vmatprep.mubr.msk.bf16.mxu1 %vm2076_vm0, %v2075_v30 }
 0x12e   :  { %1877 = vmatpush3.bf16.msra.mxu1 %v1983_v50 }
 0x12f   :  { %1878 = vmatprep.subr.bf16.mxu1 %v2075_v30 }
 0x130   :  { %1859 = vmatpush3.bf16.msra.mxu0 %v1976_v34 }
 0x131   :  { %1860 = vmatprep.subr.bf16.mxu0 %v2075_v30 }
 0x132   :  { %1879 = vmatpush3.bf16.msra.mxu1 %v1984_v51 }
 0x133   :  { %1880 = vmatprep.subr.bf16.mxu1 %v2075_v30 }
 0x134   :  { %1861 = vmatpush3.bf16.msra.mxu0 %v1977_v35 }
 0x135   :  { %1862 = vmatprep.subr.bf16.mxu0 %v2075_v30 }
 0x136   :  { %1881 = vmatpush3.bf16.msra.mxu1 %v1985_v52 }
 0x137   :  { %1882 = vmatprep.subr.bf16.mxu1 %v2075_v30 }
 0x138   :  { %1863 = vmatpush3.bf16.msra.mxu0 %v1978_v36 }
 0x139   :  { %1864 = vmatprep.subr.bf16.mxu0 %v2075_v30 }
 0x13a   :  { %1883 = vmatpush3.bf16.msra.mxu1 %v1986_v53 }
 0x13b   :  { %1884 = vmatprep.subr.bf16.mxu1 %v2075_v30 }
 0x13c   :  { %1865 = vmatpush3.bf16.msra.mxu0 %v1979_v37  ;;  %v987_v37 = vlaneseq }
 0x13d   :  { %1866 = vmatprep.subr.bf16.mxu0 %v2075_v30 }
 0x13e   :  { %1885 = vmatpush3.bf16.msra.mxu1 %v1987_v54 }
 0x13f   :  { %1886 = vmatprep.subr.bf16.mxu1 %v2075_v30 }
 0x140   :  { %1867 = vmatpush3.bf16.msra.mxu0 %v1980_v38  ;;  %v2473_v38 = vshrl.u32 %v987_v37, 7 }
 0x141   :  { %1868 = vmatprep.subr.bf16.mxu0 %v2075_v30 }
 0x142   :  { %1887 = vmatpush3.bf16.msra.mxu1 %v1988_v55 }
 0x143   :  { %1888 = vmatprep.subr.bf16.mxu1 %v2075_v30 }
 0x144   :  { %1869 = vmatpush3.bf16.msra.mxu0 %v1981_v39  ;;  %v207_v39 = vld [vmem:[%s2569_s4] sm:$0x1] }
 0x145   :  { %1870 = vmatprep.subr.bf16.mxu0 %v2075_v30 }
 0x146   :  { %1889 = vmatpush3.bf16.msra.mxu1 %v1989_v56 }
 0x147   :  { %1890 = vmatprep.subr.bf16.mxu1 %v2075_v30 }
 0x148   :  { %1871 = vmatpush3.bf16.msra.mxu0 %v1982_v40  ;;  %v2479_v40 = vsub.s32 0, %v2473_v38 }
 0x149   :  { %1896 = vmatprep.subr.bf16.mxu0 %v2075_v30 }
 0x14a   :  { %1891 = vmatpush3.bf16.msra.mxu1 %v1990_v57 }
 0x1fe   :  { %v685_v41 = vpop.f32.mrb[0].mxu0  ;;  %v845_v42 = vpop.f32.mrb[0].mxu1 }
 0x1ff   :  { %v851_v43 = vpack.c.bf16 %v845_v42, %v685_v41  ;;  %v687_v44 = vpop.f32.mrb[1].mxu0  ;;  %v847_v45 = vpop.f32.mrb[1].mxu1 }
 0x200   :  { %v688_v46 = vpop.f32.mrb[2].mxu0  ;;  %v848_v47 = vpop.f32.mrb[2].mxu1  ;;  %v208_v44 = vld [vmem:[%s2570_s5] sm:$0x1] }
 0x201   :  { %v689_v48 = vpop.f32.mrb[3].mxu0  ;;  %v849_v49 = vpop.f32.mrb[3].mxu1  ;;  %1873 = vmatmul.mubr.bf16.vlgmr.msra.gmra.mrb[4].mxu0 %v851_v43 }
 0x202   :  { %1912 = vmatprep.mubr.msk.bf16.mxu0 %vm2076_vm0, %v2075_v30 }
 0x2d4   :  { %v934_v58 = vpop.f32.mrb[4].mxu0 }
 0x2d5   :  { %v941_v59 = vrot.slane %v934_v58, 4  ;;  %v953_v60 = vmul.f32 %v934_v58, %v934_v58  ;;  %v1874_v61 = vpop.f32.mrb[5].mxu0 }
 0x2d6   :  { %v937_v62 = vpop.f32.mrb[6].mxu0 }
 0x2d7   :  { %v942_v63 = vadd.f32 %v941_v59, %v934_v58  ;;  %v955_v0 = vrot.slane %v953_v60, 4  ;;  %v947_v1 = vrot.slane %v937_v62, 4  ;;  %v954_v2 = vmul.f32 %v937_v62, %v937_v62  ;;  %v1875_v3 = vpop.f32.mrb[7].mxu0 }
 0x2d8   :  { %v1997_v3 = vld [vmem:[#allocation5 + $0x30] sm:$0xff]  }
 0x2d9   :  { %v943_v4 = vrot.slane %v942_v63, 2  ;;  %v956_v5 = vadd.f32 %v955_v0, %v953_v60  ;;  %v948_v6 = vadd.f32 %v947_v1, %v937_v62  ;;  %v961_v7 = vrot.slane %v954_v2, 4  ;;  %v1992_v0 = vld [vmem:[#allocation5 + $0x8] sm:$0xff]   ;;  %v1995_v1 = vld [vmem:[#allocation5 + $0x20] sm:$0xff]  }
 0x2db   :  { %v944_v8 = vadd.f32 %v943_v4, %v942_v63  ;;  %v957_v9 = vrot.slane %v956_v5, 2  ;;  %v949_v10 = vrot.slane %v948_v6, 2  ;;  %v962_v11 = vadd.f32 %v961_v7, %v954_v2  ;;  %v1991_v63 = vld [vmem:[#allocation5] sm:$0xff]   ;;  %v1996_v2 = vld [vmem:[#allocation5 + $0x28] sm:$0xff]   ;;  %v1998_v4 = vld [vmem:[#allocation5 + $0x38] sm:$0xff]  }
 0x2dc   :  { %1897 = vmatpush3.bf16.msra.mxu0 %v1991_v63 }
 0x2dd   :  { %v945_v12 = vrot.slane %v944_v8, 1  ;;  %v958_v13 = vadd.f32 %v957_v9, %v956_v5  ;;  %v950_v14 = vadd.f32 %v949_v10, %v948_v6  ;;  %v963_v15 = vrot.slane %v962_v11, 2  ;;  %1898 = vmatprep.subr.bf16.mxu0 %v2075_v30 }
 0x2df   :  { %v946_v16 = vadd.f32 %v945_v12, %v944_v8  ;;  %v959_v17 = vrot.slane %v958_v13, 1  ;;  %v951_v18 = vrot.slane %v950_v14, 1  ;;  %v964_v19 = vadd.f32 %v963_v15, %v962_v11 }
 0x2e0   :  { %1899 = vmatpush3.bf16.msra.mxu0 %v1992_v0 }
 0x2e1   :  { %v960_v20 = vadd.f32 %v959_v17, %v958_v13  ;;  %v967_v21 = vmul.f32 0.125, %v946_v16  ;;  %v952_v22 = vadd.f32 %v951_v18, %v950_v14  ;;  %v965_v23 = vrot.slane %v964_v19, 1  ;;  %1900 = vmatprep.subr.bf16.mxu0 %v2075_v30 }
 0x2e3   :  { %v969_v24 = vmul.f32 0.125, %v960_v20  ;;  %v971_v25 = vmul.f32 %v967_v21, %v967_v21  ;;  %v966_v26 = vadd.f32 %v965_v23, %v964_v19  ;;  %v968_v27 = vmul.f32 0.125, %v952_v22 }
 0x2e5   :  { %v973_v28 = vsub.f32 %v969_v24, %v971_v25  ;;  %v970_v29 = vmul.f32 0.125, %v966_v26  ;;  %v972_v31 = vmul.f32 %v968_v27, %v968_v27 }
 0x2e7   :  { %v975_v32 = vmax.f32 %v973_v28, 0.0  ;;  %v974_v33 = vsub.f32 %v970_v29, %v972_v31 }
 0x2e9   :  { %v977_v34 = vadd.f32 1e-05, %v975_v32  ;;  %v976_v35 = vmax.f32 %v974_v33, 0.0 }
 0x2eb   :  { %1999 = vrsqrt.f32 %v977_v34  ;;  %v978_v36 = vadd.f32 1e-05, %v976_v35 }
 0x2ed   :  { %2001 = vrsqrt.f32 %v978_v36 }
 0x2f5   :  { %v2000_v41 = vpop.eup %1999 }
 0x2f6   :  { %v981_v42 = vmul.f32 %v2000_v41, %v207_v39 }
 0x2f7   :  { %v2002_v43 = vpop.eup %2001 }
 0x2f8   :  { %v983_v45 = vmul.f32 %v981_v42, %v967_v21  ;;  %v990_v46 = vrot.slane %v981_v42, %v2479_v40  ;;  %v982_v47 = vmul.f32 %v2002_v43, %v207_v39 }
 0x2fa   :  { %v985_v48 = vsub.f32 %v208_v44, %v983_v45  ;;  %v984_v49 = vmul.f32 %v982_v47, %v968_v27  ;;  %v994_v50 = vrot.slane %v982_v47, %v2479_v40  ;;  %v995_v51 = vmul.f32 %v990_v46, %v934_v58  ;;  %v1993_v58 = vld [vmem:[#allocation5 + $0x10] sm:$0xff]  }
 0x2fb   :  { %1901 = vmatpush3.bf16.msra.mxu0 %v1993_v58 }
 0x2fc   :  { %v1002_v52 = vrot.slane %v985_v48, %v2479_v40  ;;  %v986_v53 = vsub.f32 %v208_v44, %v984_v49  ;;  %v996_v55 = vmul.f32 %v994_v50, %v937_v62  ;;  %1902 = vmatprep.subr.bf16.mxu0 %v2075_v30  ;;  %v1994_v62 = vld [vmem:[#allocation5 + $0x18] sm:$0xff]  }
 0x2fd   :  { %v209_v50 = vld [vmem:[%s2572_s7] sm:$0x1] }
 0x2fe   :  { %v1009_v54 = vadd.f32 %v1002_v52, %v995_v51  ;;  %v1006_v56 = vrot.slane %v986_v53, %v2479_v40 }
 0x2ff   :  { %1903 = vmatpush3.bf16.msra.mxu0 %v1994_v62 }
 0x300   :  { %v1010_v57 = vadd.f32 %v1006_v56, %v996_v55  ;;  %v1011_v59 = vmax.f32 %v1009_v54, 0.0  ;;  %1904 = vmatprep.subr.bf16.mxu0 %v2075_v30  ;;  %v210_v54 = vld [vmem:[#allocation2] sm:$0x1] }
 0x302   :  { %v1012_v60 = vmax.f32 %v1010_v57, 0.0 }
 0x303   :  { %1905 = vmatpush3.bf16.msra.mxu0 %v1995_v1 }
 0x304   :  { %v1013_v61 = vpack.c.bf16 %v1012_v60, %v1011_v59  ;;  %1906 = vmatprep.subr.bf16.mxu0 %v2075_v30 }
 0x306   :  { %1893 = vmatmul.mubr.bf16.vlgmr.msra.gmra.mrb[4].mxu1 %v1013_v61 }
 0x307   :  { %1907 = vmatpush3.bf16.msra.mxu0 %v1996_v2 }
 0x308   :  { %1908 = vmatprep.subr.bf16.mxu0 %v2075_v30 }
 0x30b   :  { %1909 = vmatpush3.bf16.msra.mxu0 %v1997_v3 }
 0x30c   :  { %1910 = vmatprep.subr.bf16.mxu0 %v2075_v30 }
 0x30f   :  { %1911 = vmatpush3.bf16.msra.mxu0 %v1998_v4 }
 0x3d9   :  { %v1096_v5 = vpop.f32.mrb[4].mxu1 }
 0x3da   :  { %v1103_v6 = vrot.slane %v1096_v5, 4  ;;  %v1115_v7 = vmul.f32 %v1096_v5, %v1096_v5  ;;  %v1894_v8 = vpop.f32.mrb[5].mxu1 }
 0x3db   :  { %v1099_v9 = vpop.f32.mrb[6].mxu1 }
 0x3dc   :  { %v1104_v10 = vadd.f32 %v1103_v6, %v1096_v5  ;;  %v1117_v11 = vrot.slane %v1115_v7, 4  ;;  %v1109_v12 = vrot.slane %v1099_v9, 4  ;;  %v1116_v13 = vmul.f32 %v1099_v9, %v1099_v9  ;;  %v1895_v14 = vpop.f32.mrb[7].mxu1 }
 0x3de   :  { %v1105_v15 = vrot.slane %v1104_v10, 2  ;;  %v1118_v16 = vadd.f32 %v1117_v11, %v1115_v7  ;;  %v1110_v17 = vadd.f32 %v1109_v12, %v1099_v9  ;;  %v1123_v18 = vrot.slane %v1116_v13, 4 }
 0x3e0   :  { %v1106_v19 = vadd.f32 %v1105_v15, %v1104_v10  ;;  %v1119_v20 = vrot.slane %v1118_v16, 2  ;;  %v1111_v21 = vrot.slane %v1110_v17, 2  ;;  %v1124_v30 = vadd.f32 %v1123_v18, %v1116_v13 }
 0x3e2   :  { %v1107_v22 = vrot.slane %v1106_v19, 1  ;;  %v1120_v23 = vadd.f32 %v1119_v20, %v1118_v16  ;;  %v1112_v24 = vadd.f32 %v1111_v21, %v1110_v17  ;;  %v1125_v25 = vrot.slane %v1124_v30, 2 }
 0x3e4   :  { %v1108_v26 = vadd.f32 %v1107_v22, %v1106_v19  ;;  %v1121_v27 = vrot.slane %v1120_v23, 1  ;;  %v1113_v28 = vrot.slane %v1112_v24, 1  ;;  %v1126_v29 = vadd.f32 %v1125_v25, %v1124_v30 }
 0x3e6   :  { %v1122_v31 = vadd.f32 %v1121_v27, %v1120_v23  ;;  %v1129_v32 = vmul.f32 0.125, %v1108_v26  ;;  %v1114_v33 = vadd.f32 %v1113_v28, %v1112_v24  ;;  %v1127_v34 = vrot.slane %v1126_v29, 1 }
 0x3e8   :  { %v1131_v35 = vmul.f32 0.125, %v1122_v31  ;;  %v1133_v36 = vmul.f32 %v1129_v32, %v1129_v32  ;;  %v1128_v39 = vadd.f32 %v1127_v34, %v1126_v29  ;;  %v1130_v41 = vmul.f32 0.125, %v1114_v33 }
 0x3ea   :  { %v1135_v42 = vsub.f32 %v1131_v35, %v1133_v36  ;;  %v1132_v43 = vmul.f32 0.125, %v1128_v39  ;;  %v1134_v44 = vmul.f32 %v1130_v41, %v1130_v41 }
 0x3ec   :  { %v1137_v45 = vmax.f32 %v1135_v42, 0.0  ;;  %v1136_v46 = vsub.f32 %v1132_v43, %v1134_v44 }
 0x3ee   :  { %v1139_v47 = vadd.f32 1e-05, %v1137_v45  ;;  %v1138_v48 = vmax.f32 %v1136_v46, 0.0 }
 0x3f0   :  { %2003 = vrsqrt.f32 %v1139_v47  ;;  %v1140_v49 = vadd.f32 1e-05, %v1138_v48 }
 0x3f2   :  { %2005 = vrsqrt.f32 %v1140_v49 }
 0x3fa   :  { %v2004_v51 = vpop.eup %2003 }
 0x3fb   :  { %v1143_v52 = vmul.f32 %v2004_v51, %v209_v50 }
 0x3fc   :  { %v2006_v53 = vpop.eup %2005 }
 0x3fd   :  { %v1145_v55 = vmul.f32 %v1143_v52, %v1129_v32  ;;  %v1152_v56 = vrot.slane %v1143_v52, %v2479_v40  ;;  %v1144_v57 = vmul.f32 %v2006_v53, %v209_v50 }
 0x3ff   :  { %v1147_v59 = vsub.f32 %v210_v54, %v1145_v55  ;;  %v1146_v60 = vmul.f32 %v1144_v57, %v1130_v41  ;;  %v1156_v61 = vrot.slane %v1144_v57, %v2479_v40  ;;  %v1157_v63 = vmul.f32 %v1152_v56, %v1096_v5 }
 0x401   :  { %v1164_v0 = vrot.slane %v1147_v59, %v2479_v40  ;;  %v1148_v58 = vsub.f32 %v210_v54, %v1146_v60  ;;  %v1158_v1 = vmul.f32 %v1156_v61, %v1099_v9 }
 0x403   :  { %v1171_v62 = vadd.f32 %v1164_v0, %v1157_v63  ;;  %v1168_v2 = vrot.slane %v1148_v58, %v2479_v40 }
 0x405   :  { %v1172_v3 = vadd.f32 %v1168_v2, %v1158_v1  ;;  %v1173_v4 = vmax.f32 %v1171_v62, 0.0 }
 0x407   :  { %v1174_v6 = vmax.f32 %v1172_v3, 0.0 }
 0x409   :  { %v1175_v7 = vpack.c.bf16 %v1174_v6, %v1173_v4 }
 0x40b   :  { %1913 = vmatmul.mubr.bf16.vlgmr.msra.gmra.mrb[8].mxu0 %v1175_v7 }
 0x4de   :  { %v1258_v8 = vpop.f32.mrb[8].mxu0 }
 0x4df   :  { %v1265_v10 = vrot.slane %v1258_v8, 4  ;;  %v1277_v11 = vmul.f32 %v1258_v8, %v1258_v8  ;;  %v1914_v12 = vpop.f32.mrb[9].mxu0 }
 0x4e0   :  { %v1261_v13 = vpop.f32.mrb[10].mxu0  ;;  %v1538_v12 = vadd.s32 8, %v2473_v38 }
 0x4e1   :  { %v1266_v14 = vadd.f32 %v1265_v10, %v1258_v8  ;;  %v1279_v15 = vrot.slane %v1277_v11, 4  ;;  %v1271_v5 = vrot.slane %v1261_v13, 4  ;;  %v1278_v16 = vmul.f32 %v1261_v13, %v1261_v13  ;;  %v1915_v17 = vpop.f32.mrb[11].mxu0 }
 0x4e3   :  { %v1267_v18 = vrot.slane %v1266_v14, 2  ;;  %v1280_v19 = vadd.f32 %v1279_v15, %v1277_v11  ;;  %v1272_v9 = vadd.f32 %v1271_v5, %v1261_v13  ;;  %v1285_v20 = vrot.slane %v1278_v16, 4 }
 0x4e5   :  { %v1281_v40 = vrot.slane %v1280_v19, 2  ;;  %v1273_v21 = vrot.slane %v1272_v9, 2  ;;  %v1286_v30 = vadd.f32 %v1285_v20, %v1278_v16  ;;  %v1268_v22 = vadd.f32 %v1267_v18, %v1266_v14 }
 0x4e7   :  { %v1282_v23 = vadd.f32 %v1281_v40, %v1280_v19  ;;  %v1274_v24 = vadd.f32 %v1273_v21, %v1272_v9  ;;  %v1287_v25 = vrot.slane %v1286_v30, 2  ;;  %v1269_v26 = vrot.slane %v1268_v22, 1 }
 0x4e9   :  { %v1275_v27 = vrot.slane %v1274_v24, 1  ;;  %v1288_v28 = vadd.f32 %v1287_v25, %v1286_v30  ;;  %v1270_v29 = vadd.f32 %v1269_v26, %v1268_v22  ;;  %v1283_v31 = vrot.slane %v1282_v23, 1 }
 0x4eb   :  { %v1276_v32 = vadd.f32 %v1275_v27, %v1274_v24  ;;  %v1289_v33 = vrot.slane %v1288_v28, 1  ;;  %v1284_v34 = vadd.f32 %v1283_v31, %v1282_v23  ;;  %v1291_v35 = vmul.f32 0.125, %v1270_v29 }
 0x4ec   :  { %v1540_v24 = vadd.s32 24, %v2473_v38 }
 0x4ed   :  { %v1290_v36 = vadd.f32 %v1289_v33, %v1288_v28  ;;  %v1292_v39 = vmul.f32 0.125, %v1276_v32  ;;  %v1293_v41 = vmul.f32 0.125, %v1284_v34  ;;  %v1295_v42 = vmul.f32 %v1291_v35, %v1291_v35 }
 0x4ee   :  { %v1305_v53 = vsub.f32 %v1258_v8, %v1291_v35 }
 0x4ef   :  { %v1294_v43 = vmul.f32 0.125, %v1290_v36  ;;  %v1296_v44 = vmul.f32 %v1292_v39, %v1292_v39  ;;  %v1297_v45 = vsub.f32 %v1293_v41, %v1295_v42  ;;  %v1308_v52 = vsub.f32 %v1261_v13, %v1292_v39 }
 0x4f0   :  { %v2520_v13 = vand.u32 127, %v987_v37  ;;  %v1539_v37 = vadd.s32 16, %v2473_v38  ;;  %v1541_v39 = vadd.s32 32, %v2473_v38 }
 0x4f1   :  { %v1298_v46 = vsub.f32 %v1294_v43, %v1296_v44  ;;  %v1299_v47 = vmax.f32 %v1297_v45, 0.0  ;;  %v1542_v43 = vadd.s32 40, %v2473_v38 }
 0x4f2   :  { %vm1556_vm2 = vcmp.eq.s32.totalorder %v1538_v12, %v2520_v13  ;;  %vm1555_vm3 = vcmp.eq.s32.totalorder %v2473_v38, %v2520_v13  ;;  %vm1557_vm4 = vcmp.eq.s32.totalorder %v1539_v37, %v2520_v13  ;;  %vm1558_vm5 = vcmp.eq.s32.totalorder %v1540_v24, %v2520_v13 }
 0x4f3   :  { %v1300_v48 = vmax.f32 %v1298_v46, 0.0  ;;  %v1301_v49 = vadd.f32 1e-05, %v1299_v47  ;;  %vm1559_vm6 = vcmp.eq.s32.totalorder %v1541_v39, %v2520_v13  ;;  %vm1560_vm7 = vcmp.eq.s32.totalorder %v1542_v43, %v2520_v13 }
 0x4f4   :  { %v1547_v37 = vadd.s32 80, %v2473_v38 }
 0x4f5   :  { %v1302_v50 = vadd.f32 1e-05, %v1300_v48  ;;  %2007 = vrsqrt.f32 %v1301_v49 }
 0x4f6   :  { %vm1565_vm12 = vcmp.eq.s32.totalorder %v1547_v37, %v2520_v13 }
 0x4f7   :  { %2009 = vrsqrt.f32 %v1302_v50 }
 0x4ff   :  { %v2008_v51 = vpop.eup %2007 }
 0x500   :  { %v1306_v54 = vmul.f32 0.125, %v2008_v51 }
 0x501   :  { %v2010_v55 = vpop.eup %2009 }
 0x502   :  { %v1307_v56 = vmul.f32 %v1306_v54, %v1305_v53  ;;  %v1309_v57 = vmul.f32 %v2010_v55, %v1308_v52 }
 0x504   :  { %1310 = vxpose.xlu0.b32.start.end [1/1] (short) %v1307_v56, 128  ;;  %1916 = vmatprep.subr.mxu1 %v1309_v57  ;;  %v1543_v56 = vadd.s32 48, %v2473_v38 }
 0x505   :  { %1917 = vmatpush3.msra.mxu1 %v1309_v57 }
 0x506   :  { %vm1561_vm8 = vcmp.eq.s32.totalorder %v1543_v56, %v2520_v13 }
 0x584   :  { %v1326_v59 = vpop.trf.xlu0 }
 0x585   :  { %1918 = vmatprep.mubr.msk.f32.mxu1 %vm1342_vm1, %v1326_v59 }
 0x588   :  { %v1327_v60 = vpop.trf.xlu0 }
 0x589   :  { %1919 = vmatmul.mubr.msk.f32.vlgmr.msra.gmra.mrb[8].mxu1 %vm1342_vm1, %v1327_v60  ;;  %v1544_v60 = vadd.s32 56, %v2473_v38 }
 0x58b   :  { %vm1562_vm9 = vcmp.eq.s32.totalorder %v1544_v60, %v2520_v13 }
 0x58c   :  { %v1328_v61 = vpop.trf.xlu0 }
 0x58d   :  { %1921 = vmatprep.mubr.msk.f32.mxu1 %vm1342_vm1, %v1328_v61 }
 0x590   :  { %v1329_v63 = vpop.trf.xlu0 }
 0x591   :  { %1922 = vmatmul.mubr.msk.f32.gmra.mrb[10].mxu1 %vm1342_vm1, %v1329_v63 }
 0x594   :  { %v1330_v0 = vpop.trf.xlu0 }
 0x595   :  { %1924 = vmatprep.mubr.msk.f32.mxu1 %vm1342_vm1, %v1330_v0 }
 0x598   :  { %v1331_v58 = vpop.trf.xlu0 }
 0x599   :  { %1925 = vmatmul.mubr.msk.f32.gmra.mrb[12].mxu1 %vm1342_vm1, %v1331_v58 }
 0x59c   :  { %v1332_v62 = vpop.trf.xlu0 }
 0x59d   :  { %1927 = vmatprep.mubr.msk.f32.mxu1 %vm1342_vm1, %v1332_v62 }
 0x5a0   :  { %v1333_v1 = vpop.trf.xlu0 }
 0x5a1   :  { %1928 = vmatmul.mubr.msk.f32.gmra.mrb[14].mxu1 %vm1342_vm1, %v1333_v1 }
 0x5a4   :  { %v1334_v2 = vpop.trf.xlu0 }
 0x5a5   :  { %1930 = vmatprep.mubr.msk.f32.mxu1 %vm1342_vm1, %v1334_v2 }
 0x5a8   :  { %v1335_v3 = vpop.trf.xlu0 }
 0x5a9   :  { %1931 = vmatmul.mubr.msk.f32.gmra.mrb[16].mxu1 %vm1342_vm1, %v1335_v3 }
 0x5ac   :  { %v1336_v4 = vpop.trf.xlu0 }
 0x5ad   :  { %1933 = vmatprep.mubr.msk.f32.mxu1 %vm1342_vm1, %v1336_v4 }
 0x5b0   :  { %v1337_v6 = vpop.trf.xlu0 }
 0x5b1   :  { %1934 = vmatmul.mubr.msk.f32.gmra.mrb[18].mxu1 %vm1342_vm1, %v1337_v6 }
 0x5b4   :  { %v1338_v7 = vpop.trf.xlu0 }
 0x5b5   :  { %1936 = vmatprep.mubr.msk.f32.mxu1 %vm1342_vm1, %v1338_v7 }
 0x5b8   :  { %v1339_v8 = vpop.trf.xlu0 }
 0x5b9   :  { %1937 = vmatmul.mubr.msk.f32.gmra.mrb[20].mxu1 %vm1342_vm1, %v1339_v8 }
 0x5bc   :  { %v1340_v10 = vpop.trf.xlu0 }
 0x5bd   :  { %1939 = vmatprep.mubr.msk.f32.mxu1 %vm1342_vm1, %v1340_v10  ;;  %v1545_v10 = vadd.s32 64, %v2473_v38 }
 0x5bf   :  { %vm1563_vm10 = vcmp.eq.s32.totalorder %v1545_v10, %v2520_v13 }
 0x5c0   :  { %v1341_v11 = vpop.trf.xlu0 }
 0x5c1   :  { %1940 = vmatmul.mubr.msk.f32.gmra.mrb[22].mxu1 %vm1342_vm1, %v1341_v11 }
 0x65c   :  { %v1920_v14 = vpop.f32.mrb[8].mxu1 }
 0x65d   :  { %v1797_v15 = vadd.f32 -1.0, %v1920_v14  ;;  %v1604_v5 = vmul.f32 %v1920_v14, %v1920_v14  ;;  %v1457_v16 = vpop.f32.mrb[9].mxu1  ;;  %v1546_v14 = vadd.s32 72, %v2473_v38 }
 0x65e   :  { %v1796_v17 = vadd.f32 -1.0, %v1457_v16  ;;  %v1603_v18 = vmul.f32 %v1457_v16, %v1457_v16 }
 0x65f   :  { %v1588_v19 = vmul.f32 %v1797_v15, %v1797_v15  ;;  %v1620_v9 = vmul.f32 0.0051, %v1604_v5  ;;  %vm1564_vm11 = vcmp.eq.s32.totalorder %v1546_v14, %v2520_v13 }
 0x660   :  { %v1587_v20 = vmul.f32 %v1796_v17, %v1796_v17  ;;  %v1619_v40 = vmul.f32 0.0051, %v1603_v18 }
 0x661   :  { %v1636_v21 = vsel %vm1556_vm2, %v1588_v19, %v1620_v9 }
 0x662   :  { %v1635_v30 = vsel %vm1555_vm3, %v1587_v20, %v1619_v40 }
 0x663   :  { %v1651_v22 = vadd.f32 %v1636_v21, %v1635_v30 }
 0x664   :  { %v1923_v23 = vpop.f32.mrb[10].mxu1 }
 0x665   :  { %v1799_v25 = vadd.f32 -1.0, %v1923_v23  ;;  %v1606_v26 = vmul.f32 %v1923_v23, %v1923_v23  ;;  %v1467_v27 = vpop.f32.mrb[11].mxu1 }
 0x666   :  { %v1798_v28 = vadd.f32 -1.0, %v1467_v27  ;;  %v1605_v29 = vmul.f32 %v1467_v27, %v1467_v27 }
 0x667   :  { %v1590_v31 = vmul.f32 %v1799_v25, %v1799_v25  ;;  %v1622_v32 = vmul.f32 0.0051, %v1606_v26  ;;  %v1548_v25 = vadd.s32 88, %v2473_v38 }
 0x668   :  { %v1589_v33 = vmul.f32 %v1798_v28, %v1798_v28  ;;  %v1621_v34 = vmul.f32 0.0051, %v1605_v29 }
 0x669   :  { %v1638_v41 = vsel %vm1558_vm5, %v1590_v31, %v1622_v32  ;;  %vm1566_vm13 = vcmp.eq.s32.totalorder %v1548_v25, %v2520_v13 }
 0x66a   :  { %v1637_v35 = vsel %vm1557_vm4, %v1589_v33, %v1621_v34 }
 0x66b   :  { %v1652_v36 = vadd.f32 %v1651_v22, %v1637_v35 }
 0x66c   :  { %v1926_v42 = vpop.f32.mrb[12].mxu1 }
 0x66d   :  { %v1801_v44 = vadd.f32 -1.0, %v1926_v42  ;;  %v1608_v45 = vmul.f32 %v1926_v42, %v1926_v42  ;;  %v1477_v46 = vpop.f32.mrb[13].mxu1  ;;  %v1653_v47 = vadd.f32 %v1652_v36, %v1638_v41  ;;  %v1549_v42 = vadd.s32 96, %v2473_v38 }
 0x66e   :  { %v1800_v48 = vadd.f32 -1.0, %v1477_v46  ;;  %v1607_v49 = vmul.f32 %v1477_v46, %v1477_v46 }
 0x66f   :  { %v1592_v50 = vmul.f32 %v1801_v44, %v1801_v44  ;;  %v1624_v51 = vmul.f32 0.0051, %v1608_v45  ;;  %vm1567_vm14 = vcmp.eq.s32.totalorder %v1549_v42, %v2520_v13 }
 0x670   :  { %v1591_v52 = vmul.f32 %v1800_v48, %v1800_v48  ;;  %v1623_v53 = vmul.f32 0.0051, %v1607_v49  ;;  %v1550_v48 = vadd.s32 104, %v2473_v38 }
 0x671   :  { %v1640_v57 = vsel %vm1560_vm7, %v1592_v50, %v1624_v51 }
 0x672   :  { %v1639_v54 = vsel %vm1559_vm6, %v1591_v52, %v1623_v53  ;;  %vm1568_vm15 = vcmp.eq.s32.totalorder %v1550_v48, %v2520_v13 }
 0x673   :  { %v1654_v55 = vadd.f32 %v1653_v47, %v1639_v54 }
 0x674   :  { %v1929_v59 = vpop.f32.mrb[14].mxu1 }
 0x675   :  { %v1803_v61 = vadd.f32 -1.0, %v1929_v59  ;;  %v1610_v63 = vmul.f32 %v1929_v59, %v1929_v59  ;;  %v1487_v0 = vpop.f32.mrb[15].mxu1  ;;  %v1655_v58 = vadd.f32 %v1654_v55, %v1640_v57  ;;  %v1551_v57 = vadd.s32 112, %v2473_v38 }
 0x676   :  { %v1802_v62 = vadd.f32 -1.0, %v1487_v0  ;;  %v1609_v1 = vmul.f32 %v1487_v0, %v1487_v0 }
 0x677   :  { %v1594_v2 = vmul.f32 %v1803_v61, %v1803_v61  ;;  %v1626_v3 = vmul.f32 0.0051, %v1610_v63  ;;  %vm1569_vm0 = vcmp.eq.s32.totalorder %v1551_v57, %v2520_v13 }
 0x678   :  { %v1593_v4 = vmul.f32 %v1802_v62, %v1802_v62  ;;  %v1625_v6 = vmul.f32 0.0051, %v1609_v1  ;;  %v1552_v62 = vadd.s32 120, %v2473_v38 }
 0x679   :  { %v1642_v11 = vsel %vm1562_vm9, %v1594_v2, %v1626_v3 }
 0x67a   :  { %v1641_v7 = vsel %vm1561_vm8, %v1593_v4, %v1625_v6  ;;  %vm1570_vm1 = vcmp.eq.s32.totalorder %v1552_v62, %v2520_v13 }
 0x67b   :  { %v1656_v8 = vadd.f32 %v1655_v58, %v1641_v7 }
 0x67c   :  { %v1932_v12 = vpop.f32.mrb[16].mxu1 }
 0x67d   :  { %v1805_v15 = vadd.f32 -1.0, %v1932_v12  ;;  %v1612_v5 = vmul.f32 %v1932_v12, %v1932_v12  ;;  %v1497_v16 = vpop.f32.mrb[17].mxu1  ;;  %v1657_v17 = vadd.f32 %v1656_v8, %v1642_v11 }
 0x67e   :  { %v1804_v18 = vadd.f32 -1.0, %v1497_v16  ;;  %v1611_v19 = vmul.f32 %v1497_v16, %v1497_v16 }
 0x67f   :  { %v1596_v9 = vmul.f32 %v1805_v15, %v1805_v15  ;;  %v1628_v20 = vmul.f32 0.0051, %v1612_v5 }
 0x680   :  { %v1595_v40 = vmul.f32 %v1804_v18, %v1804_v18  ;;  %v1627_v21 = vmul.f32 0.0051, %v1611_v19 }
 0x681   :  { %v1644_v23 = vsel %vm1564_vm11, %v1596_v9, %v1628_v20 }
 0x682   :  { %v1643_v30 = vsel %vm1563_vm10, %v1595_v40, %v1627_v21 }
 0x683   :  { %v1658_v22 = vadd.f32 %v1657_v17, %v1643_v30 }
 0x684   :  { %v1935_v24 = vpop.f32.mrb[18].mxu1 }
 0x685   :  { %v1807_v26 = vadd.f32 -1.0, %v1935_v24  ;;  %v1614_v27 = vmul.f32 %v1935_v24, %v1935_v24  ;;  %v1507_v28 = vpop.f32.mrb[19].mxu1  ;;  %v1659_v29 = vadd.f32 %v1658_v22, %v1644_v23 }
 0x686   :  { %v1806_v31 = vadd.f32 -1.0, %v1507_v28  ;;  %v1613_v32 = vmul.f32 %v1507_v28, %v1507_v28 }
 0x687   :  { %v1598_v33 = vmul.f32 %v1807_v26, %v1807_v26  ;;  %v1630_v34 = vmul.f32 0.0051, %v1614_v27 }
 0x688   :  { %v1597_v35 = vmul.f32 %v1806_v31, %v1806_v31  ;;  %v1629_v36 = vmul.f32 0.0051, %v1613_v32 }
 0x689   :  { %v1646_v43 = vsel %vm1566_vm13, %v1598_v33, %v1630_v34 }
 0x68a   :  { %v1645_v39 = vsel %vm1565_vm12, %v1597_v35, %v1629_v36 }
 0x68b   :  { %v1660_v41 = vadd.f32 %v1659_v29, %v1645_v39 }
 0x68c   :  { %v1938_v44 = vpop.f32.mrb[20].mxu1 }
 0x68d   :  { %v1809_v45 = vadd.f32 -1.0, %v1938_v44  ;;  %v1616_v46 = vmul.f32 %v1938_v44, %v1938_v44  ;;  %v1517_v47 = vpop.f32.mrb[21].mxu1  ;;  %v1661_v49 = vadd.f32 %v1660_v41, %v1646_v43 }
 0x68e   :  { %v1808_v50 = vadd.f32 -1.0, %v1517_v47  ;;  %v1615_v51 = vmul.f32 %v1517_v47, %v1517_v47 }
 0x68f   :  { %v1600_v52 = vmul.f32 %v1809_v45, %v1809_v45  ;;  %v1632_v53 = vmul.f32 0.0051, %v1616_v46 }
 0x690   :  { %v1599_v54 = vmul.f32 %v1808_v50, %v1808_v50  ;;  %v1631_v55 = vmul.f32 0.0051, %v1615_v51 }
 0x691   :  { %v1648_v61 = vsel %vm1568_vm15, %v1600_v52, %v1632_v53 }
 0x692   :  { %v1647_v56 = vsel %vm1567_vm14, %v1599_v54, %v1631_v55 }
 0x693   :  { %v1662_v59 = vadd.f32 %v1661_v49, %v1647_v56 }
 0x694   :  { %v1941_v60 = vpop.f32.mrb[22].mxu1 }
 0x695   :  { %v1811_v63 = vadd.f32 -1.0, %v1941_v60  ;;  %v1618_v0 = vmul.f32 %v1941_v60, %v1941_v60  ;;  %v1527_v58 = vpop.f32.mrb[23].mxu1  ;;  %v1663_v1 = vadd.f32 %v1662_v59, %v1648_v61 }
 0x696   :  { %v1810_v2 = vadd.f32 -1.0, %v1527_v58  ;;  %v1617_v3 = vmul.f32 %v1527_v58, %v1527_v58 }
 0x697   :  { %v1602_v4 = vmul.f32 %v1811_v63, %v1811_v63  ;;  %v1634_v6 = vmul.f32 0.0051, %v1618_v0 }
 0x698   :  { %v1601_v7 = vmul.f32 %v1810_v2, %v1810_v2  ;;  %v1633_v8 = vmul.f32 0.0051, %v1617_v3 }
 0x699   :  { %v1650_v12 = vsel %vm1570_vm1, %v1602_v4, %v1634_v6 }
 0x69a   :  { %v1649_v10 = vsel %vm1569_vm0, %v1601_v7, %v1633_v8 }
 0x69b   :  { %v1664_v11 = vadd.f32 %v1663_v1, %v1649_v10 }
 0x69d   :  { %v1665_v14 = vadd.f32 %v1664_v11, %v1650_v12 }
 0x69f   :  { %1666 = vadd.xlane.f32.xlu0 %v1665_v14 }
 0x72c   :  { %v1667_v15 = vpop.xlane.xlu0 %1666 }
 0x72d   :  { %v1668_v5 = vrot.slane %v1667_v15, 4 }
 0x72f   :  { %v1669_v16 = vadd.f32 %v1668_v5, %v1667_v15 }
 0x731   :  { %v1670_v38 = vrot.slane %v1669_v16, 2 }
 0x733   :  { %v1671_v17 = vadd.f32 %v1670_v38, %v1669_v16 }
 0x735   :  { %v1672_v18 = vrot.slane %v1671_v17, 1 }
 0x737   :  { %v1673_v19 = vadd.f32 %v1672_v18, %v1671_v17 }
 0x739   :  { %1966 = vpush %v1673_v19 }
 0x76a   :  { %s1967_s7 = spop %1966 }
 0x76b   :  { %1676 = sst [smem:[#allocation7]] %s1967_s7 }
 0x76c   :  { %2064 = shalt.err (!%p2061_p4)
}
 0x76d   :  { %s2077_s3 = smov [#allocation7]  }
 0x76e   :  { %1684 = dma.smem_to_hbm %s2077_s3, 16, %s2575_s10, [#allocation4]  }
 0x76f   :  { %2069 = dma.done.wait [#allocation4], 16  }
 0x770   :  { %2070 = vsyncadd [#allocation4], 4294967280 }
 0x771   :  { %1688 = sfence }
 0x772   :  { %1689 = vsyncpa [#allocation3], 1 }
 0x773   :  { %1690 = vsyncpa [#allocation6], 1 }
 0x774   :  { %1691 = vsyncpa [#allocation4], 1 }

</bundles_post_ra>
